<compile_context>
chip_gen: v6e
topology: v6e:2x2x1
jax: 0.10.0
libtpu: 0.0.40
codegen_flags: <defaults>
</compile_context>

<pallas_src>
import functools

import jax
import jax.numpy as jnp
from jax.experimental import pallas as pl
from jax.experimental.pallas import tpu as pltpu


# ----------------------------------------------------------------------------
# Pallas kernel: one (exemplar patch ii, query patch jj) co-attention step over
# the whole batch.  grid = (ii, jj); jj is the innermost sequential reduction.
# ----------------------------------------------------------------------------
def _coattention_graph_kernel(inv_patch_num, channels,
                              eproj_t_ref, q_ref, out_ref):
    # eproj_t_ref : (B, N, C+2) bf16  (W_e @ E)^T for patch ii; last 2 columns are zero
    # q_ref       : (B, C+2, N) bf16  rows 0..C-1 = Q, row C = w_g·Q, row C+1 = ones
    # out_ref     : (B, C, N)   f32   output for patch ii (VMEM-resident across jj)
    jj = pl.program_id(1)

    @pl.when(jj == 0)
    def _():
        out_ref[...] = jnp.zeros_like(out_ref)

    ep = eproj_t_ref[...]                 # (B, Ne, C+2) bf16
    q = q_ref[...]                        # (B, C+2, Nq) bf16

    # A[b, ne, nq] = sum_c (W_e E)[b, c, ne] * Q[b, c, nq]
    # (the gate / ones rows of Qext contract against zero columns of Eproj^T).
    a = jax.lax.dot_general(ep, q, (((2,), (1,)), ((0,), (0,))),
                            preferred_element_type=jnp.float32)        # (B, Ne, Nq) f32

    # Deferred softmax: un-normalized exp only; the denominator falls out of the
    # second matmul via the appended ones-row of Qext.
    p_un = jnp.exp(a - jnp.max(a, axis=-1, keepdims=True)).astype(jnp.bfloat16)

    # att_ext[b, r, ne] = sum_nq Qext[b, r, nq] * p_un[b, ne, nq]
    #   r < C   -> un-normalized attention output
    #   r = C   -> un-normalized gate logits (w_g · att, by linearity of the 1x1 conv)
    #   r = C+1 -> softmax denominator  sum_nq p_un
    att_ext = jax.lax.dot_general(q, p_un, (((2,), (2,)), ((0,), (0,))),
                                  preferred_element_type=jnp.float32)   # (B, C+2, Ne)

    att_un = att_ext[:, :channels, :]                       # (B, C, Ne)
    gate_un = att_ext[:, channels:channels + 1, :]          # (B, 1, Ne)
    denom = att_ext[:, channels + 1:channels + 2, :]        # (B, 1, Ne)

    inv_s = pl.reciprocal(denom, approx=True)               # EUP slot, ~free
    mask = jax.nn.sigmoid(gate_un * inv_s)                  # (B, 1, Ne)
    out_ref[...] += att_un * (inv_s * mask)

    @pl.when(jj == pl.num_programs(1) - 1)
    def _():
        out_ref[...] = out_ref[...] * inv_patch_num


# ----------------------------------------------------------------------------
# Wrapper
# ----------------------------------------------------------------------------
@functools.partial(jax.jit, static_argnames=("patch_num",))
def _graph_inter_connection_stacked(x, w_e, w_g, patch_num=16):
    """x: (P, B, C, H, W) stacked patches (NCHW per patch). Returns same shape (f32)."""
    Pn, B, C, H, W = x.shape
    if H != W:
        # PyTorch views with fea_size[0] * fea_size[0]; only square maps are valid.
        raise ValueError("GraphInterConnection requires square feature maps (H == W).")
    N = H * W
    x_flat = x.reshape(Pn, B, C, N).astype(jnp.float32)     # channel-first, lane-dense pixels

    # Pre-projections, once over all patches (feeds the Pallas co-attention kernel):
    #   eproj_t[p,b,n,o] = sum_c W_e[o,c] * x[p,b,c,n]      -- (W_e @ E)^T, MXU-native lhs
    #   gq[p,b,n]        = sum_c w_g[c]   * x[p,b,c,n]      -- gate projection of the query
    eproj_t = jnp.einsum("oc,pbcn->pbno", w_e, x_flat)
    gq = jnp.einsum("c,pbcn->pbn", w_g, x_flat)

    c2 = C + 2
    eproj_t_ext = jnp.concatenate(
        [eproj_t, jnp.zeros((Pn, B, N, 2), eproj_t.dtype)], axis=-1
    ).astype(jnp.bfloat16)                                  # (Pn, B, N, C+2)
    q_ext = jnp.concatenate(
        [x_flat, gq[:, :, None, :], jnp.ones((Pn, B, 1, N), x_flat.dtype)], axis=2
    ).astype(jnp.bfloat16)                                  # (Pn, B, C+2, N)

    kernel = functools.partial(_coattention_graph_kernel, 1.0 / patch_num, C)

    out = pl.pallas_call(
        kernel,
        out_shape=jax.ShapeDtypeStruct((Pn, B, C, N), jnp.float32),
        grid_spec=pltpu.PrefetchScalarGridSpec(
            num_scalar_prefetch=0,
            grid=(Pn, Pn),                                  # (ii, jj); jj = reduction
            in_specs=[
                pl.BlockSpec((None, B, N, c2), lambda ii, jj: (ii, 0, 0, 0)),  # Eproj^T (patch ii)
                pl.BlockSpec((None, B, c2, N), lambda ii, jj: (jj, 0, 0, 0)),  # Qext    (patch jj)
            ],
            out_specs=pl.BlockSpec((None, B, C, N), lambda ii, jj: (ii, 0, 0, 0)),
        ),
        compiler_params=pltpu.CompilerParams(
            dimension_semantics=("parallel", "arbitrary")),
    )(eproj_t_ext, q_ext)

    return out.reshape(Pn, B, C, H, W)


def graph_inter_connection(temp, w_e, w_g, patch_num=16):
    """Mirrors GraphInterConnection.forward: temp is a list of (B, C, H, W) arrays."""
    # TODO(synk): self.conv_fusion (3x3 conv) is constructed in __init__ but never used
    #             in forward, so it is intentionally not implemented here.
    x = jnp.stack(temp, axis=0)
    out = _graph_inter_connection_stacked(x, w_e, w_g, patch_num=patch_num)
    return [out[i] for i in range(out.shape[0])]


# ----------------------------------------------------------------------------
# Pure-JAX f32 reference (mirrors the PyTorch ops 1:1) for verification.
# ----------------------------------------------------------------------------
def _coattention_ref(exemplar, query, w_e, w_g):
    B, C, H, W = exemplar.shape
    N = H * W
    hi = jax.lax.Precision.HIGHEST
    e_flat = exemplar.reshape(B, C, N)
    q_flat = query.reshape(B, C, N)
    e_t = jnp.swapaxes(e_flat, 1, 2)                                   # (B, N, C)
    e_corr = jnp.einsum("bnc,oc->bno", e_t, w_e, precision=hi)         # linear_e
    A = jnp.einsum("bno,bom->bnm", e_corr, q_flat, precision=hi)       # (B, Ne, Nq)
    A_t = jnp.swapaxes(A, 1, 2)                                        # (B, Nq, Ne)
    Bm = jax.nn.softmax(A_t, axis=1)                                   # softmax over Nq
    att = jnp.einsum("bcq,bqe->bce", q_flat, Bm, precision=hi)         # (B, C, Ne)
    att_img = att.reshape(B, C, H, W)
    mask = jax.nn.sigmoid(jnp.einsum("bchw,c->bhw", att_img, w_g, precision=hi))
    return att_img * mask[:, None, :, :]


def graph_inter_connection_ref(temp, w_e, w_g, patch_num=16):
    outs = []
    for ii in range(len(temp)):
        acc = _coattention_ref(temp[ii], temp[ii], w_e, w_g)
        for jj in range(len(temp)):
            if jj != ii:
                acc = acc + _coattention_ref(temp[ii], temp[jj], w_e, w_g)
        outs.append(acc / patch_num)
    return outs


# ----------------------------------------------------------------------------
# Smoke test
# ----------------------------------------------------------------------------
if __name__ == "__main__":
    P_patches, B, C, H, W = 3, 2, 32, 16, 16      # N = H*W = 256 pixels on the lane axis

    key = jax.random.PRNGKey(0)
    kx, ke, kg = jax.random.split(key, 3)
    temp = [0.5 * jax.random.normal(k, (B, C, H, W), jnp.float32)
            for k in jax.random.split(kx, P_patches)]
    w_e = 0.1 * jax.random.normal(ke, (C, C), jnp.float32)   # nn.Linear(C, C, bias=False): (out, in)
    w_g = 0.1 * jax.random.normal(kg, (C,), jnp.float32)     # nn.Conv2d(C, 1, 1, bias=False) weight

    out = graph_inter_connection(temp, w_e, w_g, patch_num=16)
    out = jax.block_until_ready(out)

    ref = graph_inter_connection_ref(temp, w_e, w_g, patch_num=16)
    # bf16 MXU operands / bf16 I/O / approx reciprocal -> looser tolerance vs the f32 ref.
    for o, r in zip(out, ref):
        assert o.shape == (B, C, H, W)
        err = float(jnp.max(jnp.abs(o - r)))
        assert jnp.allclose(o, r, atol=2e-2, rtol=2e-2), f"max abs err {err}"

    print("KERNEL_OK")
</pallas_src>

<mosaic_0001>
module attributes {stable_mosaic.version = 11 : i64} {
  func.func @_coattention_graph_kernel(%arg0: i32, %arg1: i32, %arg2: memref<1x2x256x34xbf16, #tpu.memory_space<vmem>>, %arg3: memref<1x2x34x256xbf16, #tpu.memory_space<vmem>>, %arg4: memref<1x2x32x256xf32, #tpu.memory_space<vmem>>) attributes {dimension_semantics = [#tpu.dimension_semantics<parallel>, #tpu.dimension_semantics<arbitrary>], iteration_bounds = array<i64: 3, 3>, scalar_prefetch = 0 : i64, scratch_operands = 0 : i64, tpu.core_type = #tpu.core_type<tc>, window_params = [{transform_indices = @transform_0, window_bounds = array<i64: 1, 2, 256, 34>}, {transform_indices = @transform_1, window_bounds = array<i64: 1, 2, 34, 256>}, {transform_indices = @transform_2, window_bounds = array<i64: 1, 2, 32, 256>}]} {
    %c0_i32 = arith.constant 0 : i32
    %0 = arith.cmpi eq, %arg1, %c0_i32 : i32
    %1 = arith.extui %0 : i1 to i32
    %c0_i32_0 = arith.constant 0 : i32
    %2 = arith.cmpi ne, %1, %c0_i32_0 : i32
    scf.if %2 {
      %cst_20 = arith.constant 0.000000e+00 : f32
      %37 = vector.broadcast %cst_20 : f32 to vector<2x32x256xf32>
      %c0_21 = arith.constant 0 : index
      %c0_22 = arith.constant 0 : index
      %c0_23 = arith.constant 0 : index
      %c0_24 = arith.constant 0 : index
      %38 = vector.load %arg4[%c0_21, %c0_22, %c0_23, %c0_24] : memref<1x2x32x256xf32, #tpu.memory_space<vmem>>, vector<1x2x32x256xf32>
      %39 = vector.shape_cast %38 : vector<1x2x32x256xf32> to vector<2x32x256xf32>
      %40 = vector.shape_cast %37 : vector<2x32x256xf32> to vector<1x2x32x256xf32>
      tpu.vector_store %arg4[%c0_21, %c0_22, %c0_23, %c0_24], %40 {strides = array<i32>} : memref<1x2x32x256xf32, #tpu.memory_space<vmem>>, vector<1x2x32x256xf32>,
    } else {
    }
    %c0 = arith.constant 0 : index
    %c0_1 = arith.constant 0 : index
    %c0_2 = arith.constant 0 : index
    %c0_3 = arith.constant 0 : index
    %3 = vector.load %arg2[%c0, %c0_1, %c0_2, %c0_3] : memref<1x2x256x34xbf16, #tpu.memory_space<vmem>>, vector<1x2x256x34xbf16>
    %4 = vector.shape_cast %3 : vector<1x2x256x34xbf16> to vector<2x256x34xbf16>
    %c0_4 = arith.constant 0 : index
    %c0_5 = arith.constant 0 : index
    %c0_6 = arith.constant 0 : index
    %c0_7 = arith.constant 0 : index
    %5 = vector.load %arg3[%c0_4, %c0_5, %c0_6, %c0_7] : memref<1x2x34x256xbf16, #tpu.memory_space<vmem>>, vector<1x2x34x256xbf16>
    %6 = vector.shape_cast %5 : vector<1x2x34x256xbf16> to vector<2x34x256xbf16>
    %cst = arith.constant dense<0.000000e+00> : vector<2x256x256xf32>
    %7 = tpu.matmul %4, %6, %cst {dimension_numbers = #tpu.dot_dimension_numbers<[2], [1], [1], [2], [0, 0, 0, 1, 1, 2], [0], [0]>} : vector<2x256x34xbf16>, vector<2x34x256xbf16>, vector<2x256x256xf32> -> vector<2x256x256xf32>
    %cst_8 = arith.constant dense<0xFF800000> : vector<2x256xf32>
    %8 = vector.multi_reduction <maximumf>, %7, %cst_8 [2] : vector<2x256x256xf32> to vector<2x256xf32>
    %9 = vector.shape_cast %8 : vector<2x256xf32> to vector<2x256x1xf32>
    %10 = vector.broadcast %9 : vector<2x256x1xf32> to vector<2x256x256xf32>
    %11 = arith.subf %7, %10 : vector<2x256x256xf32>
    %12 = math.exp %11 : vector<2x256x256xf32>
    %13 = arith.truncf %12 : vector<2x256x256xf32> to vector<2x256x256xbf16>
    %cst_9 = arith.constant dense<0.000000e+00> : vector<2x34x256xf32>
    %14 = tpu.matmul %6, %13, %cst_9 {dimension_numbers = #tpu.dot_dimension_numbers<[2], [2], [1], [1], [0, 0, 0, 1, 1, 1], [0], [0]>} : vector<2x34x256xbf16>, vector<2x256x256xbf16>, vector<2x34x256xf32> -> vector<2x34x256xf32>
    %15 = vector.extract_strided_slice %14 {offsets = [0, 0, 0], sizes = [2, 32, 256], strides = [1, 1, 1]} : vector<2x34x256xf32> to vector<2x32x256xf32>
    %16 = vector.extract_strided_slice %14 {offsets = [0, 32, 0], sizes = [2, 1, 256], strides = [1, 1, 1]} : vector<2x34x256xf32> to vector<2x1x256xf32>
    %17 = vector.extract_strided_slice %14 {offsets = [0, 33, 0], sizes = [2, 1, 256], strides = [1, 1, 1]} : vector<2x34x256xf32> to vector<2x1x256xf32>
    %18 = tpu.reciprocal %17 {approx = true} : vector<2x1x256xf32> -> vector<2x1x256xf32>
    %19 = arith.mulf %16, %18 : vector<2x1x256xf32>
    %20 = arith.negf %19 : vector<2x1x256xf32>
    %21 = math.exp %20 : vector<2x1x256xf32>
    %cst_10 = arith.constant 1.000000e+00 : f32
    %22 = vector.broadcast %cst_10 : f32 to vector<2x1x256xf32>
    %23 = arith.addf %22, %21 : vector<2x1x256xf32>
    %24 = arith.divf %22, %23 : vector<2x1x256xf32>
    %c0_11 = arith.constant 0 : index
    %c0_12 = arith.constant 0 : index
    %c0_13 = arith.constant 0 : index
    %c0_14 = arith.constant 0 : index
    %25 = vector.load %arg4[%c0_11, %c0_12, %c0_13, %c0_14] : memref<1x2x32x256xf32, #tpu.memory_space<vmem>>, vector<1x2x32x256xf32>
    %26 = vector.shape_cast %25 : vector<1x2x32x256xf32> to vector<2x32x256xf32>
    %27 = arith.mulf %18, %24 : vector<2x1x256xf32>
    %28 = vector.broadcast %27 : vector<2x1x256xf32> to vector<2x32x256xf32>
    %29 = arith.mulf %15, %28 : vector<2x32x256xf32>
    %30 = arith.addf %26, %29 : vector<2x32x256xf32>
    %c0_15 = arith.constant 0 : index
    %c0_16 = arith.constant 0 : index
    %c0_17 = arith.constant 0 : index
    %c0_18 = arith.constant 0 : index
    %31 = vector.load %arg4[%c0_15, %c0_16, %c0_17, %c0_18] : memref<1x2x32x256xf32, #tpu.memory_space<vmem>>, vector<1x2x32x256xf32>
    %32 = vector.shape_cast %31 : vector<1x2x32x256xf32> to vector<2x32x256xf32>
    %33 = vector.shape_cast %30 : vector<2x32x256xf32> to vector<1x2x32x256xf32>
    tpu.vector_store %arg4[%c0_15, %c0_16, %c0_17, %c0_18], %33 {strides = array<i32>} : memref<1x2x32x256xf32, #tpu.memory_space<vmem>>, vector<1x2x32x256xf32>,
    %c2_i32 = arith.constant 2 : i32
    %34 = arith.cmpi eq, %arg1, %c2_i32 : i32
    %35 = arith.extui %34 : i1 to i32
    %c0_i32_19 = arith.constant 0 : i32
    %36 = arith.cmpi ne, %35, %c0_i32_19 : i32
    scf.if %36 {
      %c0_20 = arith.constant 0 : index
      %c0_21 = arith.constant 0 : index
      %c0_22 = arith.constant 0 : index
      %c0_23 = arith.constant 0 : index
      %37 = vector.load %arg4[%c0_20, %c0_21, %c0_22, %c0_23] : memref<1x2x32x256xf32, #tpu.memory_space<vmem>>, vector<1x2x32x256xf32>
      %38 = vector.shape_cast %37 : vector<1x2x32x256xf32> to vector<2x32x256xf32>
      %cst_24 = arith.constant 6.250000e-02 : f32
      %39 = vector.broadcast %cst_24 : f32 to vector<2x32x256xf32>
      %40 = arith.mulf %38, %39 : vector<2x32x256xf32>
      %c0_25 = arith.constant 0 : index
      %c0_26 = arith.constant 0 : index
      %c0_27 = arith.constant 0 : index
      %c0_28 = arith.constant 0 : index
      %41 = vector.load %arg4[%c0_25, %c0_26, %c0_27, %c0_28] : memref<1x2x32x256xf32, #tpu.memory_space<vmem>>, vector<1x2x32x256xf32>
      %42 = vector.shape_cast %41 : vector<1x2x32x256xf32> to vector<2x32x256xf32>
      %43 = vector.shape_cast %40 : vector<2x32x256xf32> to vector<1x2x32x256xf32>
      tpu.vector_store %arg4[%c0_25, %c0_26, %c0_27, %c0_28], %43 {strides = array<i32>} : memref<1x2x32x256xf32, #tpu.memory_space<vmem>>, vector<1x2x32x256xf32>,
    } else {
    }
    return
  }
  func.func @transform_0(%arg0: i32, %arg1: i32) -> (i32, i32, i32, i32) {
    %c0_i32 = arith.constant 0 : i32
    %c0_i32_0 = arith.constant 0 : i32
    %c0_i32_1 = arith.constant 0 : i32
    %c0_i32_2 = arith.constant 0 : i32
    return %arg0, %c0_i32, %c0_i32_0, %c0_i32_1 : i32, i32, i32, i32
  }
  func.func @transform_1(%arg0: i32, %arg1: i32) -> (i32, i32, i32, i32) {
    %c0_i32 = arith.constant 0 : i32
    %c0_i32_0 = arith.constant 0 : i32
    %c0_i32_1 = arith.constant 0 : i32
    %c0_i32_2 = arith.constant 0 : i32
    return %arg1, %c0_i32, %c0_i32_0, %c0_i32_1 : i32, i32, i32, i32
  }
  func.func @transform_2(%arg0: i32, %arg1: i32) -> (i32, i32, i32, i32) {
    %c0_i32 = arith.constant 0 : i32
    %c0_i32_0 = arith.constant 0 : i32
    %c0_i32_1 = arith.constant 0 : i32
    %c0_i32_2 = arith.constant 0 : i32
    return %arg0, %c0_i32, %c0_i32_0, %c0_i32_1 : i32, i32, i32, i32
  }
}

</mosaic_0001>

<bundles_post_ra>
// kernel: _graph_inter_connection_stacked.1
= control target key start
LH: loop header
LB: loop body
LE: loop exit
PB: predicated region body
PF: predicated region fallthrough
CT: control target
= control target key end

     0   :  { %s2545_s9 = smov 0   ;;  %s2547_s10 = smov 0   ;;  %s3394_s0 = inlined_call_operand.vmem [shape: bf16[3,2,256,34], index: 0, kind: input, shape index: {}]   ;;  %s3395_s1 = inlined_call_operand.vmem [shape: bf16[3,2,34,256], index: 1, kind: input, shape index: {}]   ;;  %s3396_s2 = inlined_call_operand.vmem [shape: f32[3,2,32,256], index: 2, kind: output, shape index: {}]  }
   0x1   :  { %s2549_s11 = smov 0   ;;  %s2551_s12 = smov 0  }
   0x2   :  { %s2553_s13 = smov 0  }
   0x3 LB: > { %s21_s14 = sadd.s32 1, %s2518_s11  ;;  %s24_s15 = sadd.s32 1, %s2522_s12  ;;  %s2526_s13 = sphi %s2553_s13, %s12_s13   ;;  %s2522_s12 = sphi %s2551_s12, %s3704_s12   ;;  %s2518_s11 = sphi %s2549_s11, %s3703_s11   ;;  %s2514_s10 = sphi %s2547_s10, %s3702_s10   ;;  %s2510_s9 = sphi %s2545_s9, %s3701_s9  }
   0x4   : > { %p22_p0 = scmp.ge.s32.totalorder %s21_s14, 3  ;;  %p2017_p1 = scmp.ge.s32.totalorder %s2526_s13, 1 }
   0x5   : > { %p134_p2 = scmp.lt.s32.totalorder %s2526_s13, 10 }
   0x6   : > { %s3706_s14 = smov (%p22_p0, %s21_s14), 0  ;;  %s3708_s15 = smov (!%p22_p0, %s24_s15), %s2522_s12 }
   0x7   : > { %p135_p3 = pnand %p2017_p1, %p134_p2  ;;  %p26_p4 = scmp.ge.s32.totalorder %s3708_s15, 3 }
   0x9   : > { %s3710_s15 = smov (%p26_p4, %s3708_s15), 0  ;;  %138 = sbr.rel (%p135_p3) target bundleno = 887 (0x377), region = 28 }
   0xe   : > { %p161_p5 = scmp.lt.s32.totalorder %s2514_s10, 2  ;;  %p166_p6 = scmp.lt.s32.totalorder %s2510_s9, 2 }
   0xf   : > { %p2023_p7 = scmp.ne.s32.totalorder %s2510_s9, 0 }
  0x10   : > { %s3712_s10 = smov (!%p161_p5, %s2514_s10), 2 }
  0x11   : > { %s167_s16 = scalar_select %p166_p6, %s2510_s9, 2 }
  0x12   : > { %s2109_s17 = sshll.u32 %s3712_s10, 8  ;;  %s2110_s18 = sshll.u32 %s3712_s10, 7 }
  0x13   : > { %s2582_s21 = scalar_lea.vmem %s3394_s0, %s2109_s17  ;;  %s2111_s22 = smul.u32 80, %s167_s16 }
  0x14   : > { %s2587_s25 = scalar_lea.vmem %s3396_s2, %s2110_s18  ;;  %180 = sbr.rel (%p2023_p7) target bundleno = 34 (0x22), region = 32 }
  0x15   : > { %s2592_s28 = scalar_lea.vmem %s3395_s1, %s2111_s22 }
  0x19   : > { %v2528_v0 = vmov 0.0  }
  0x1a   : > { %181 = vst [vmem:[%s2587_s25] sm:$0xff] %v2528_v0  ;;  %182 = vst [vmem:[%s2587_s25 + $0x8] sm:$0xff] %v2528_v0 }
  0x1b   : > { %183 = vst [vmem:[%s2587_s25 + $0x10] sm:$0xff] %v2528_v0  ;;  %184 = vst [vmem:[%s2587_s25 + $0x18] sm:$0xff] %v2528_v0 }
  0x1c   : > { %185 = vst [vmem:[%s2587_s25 + $0x20] sm:$0xff] %v2528_v0  ;;  %186 = vst [vmem:[%s2587_s25 + $0x28] sm:$0xff] %v2528_v0 }
  0x1d   : > { %187 = vst [vmem:[%s2587_s25 + $0x30] sm:$0xff] %v2528_v0  ;;  %188 = vst [vmem:[%s2587_s25 + $0x38] sm:$0xff] %v2528_v0 }
  0x1e   : > { %189 = vst [vmem:[%s2587_s25 + $0x40] sm:$0xff] %v2528_v0  ;;  %190 = vst [vmem:[%s2587_s25 + $0x48] sm:$0xff] %v2528_v0 }
  0x1f   : > { %191 = vst [vmem:[%s2587_s25 + $0x50] sm:$0xff] %v2528_v0  ;;  %192 = vst [vmem:[%s2587_s25 + $0x58] sm:$0xff] %v2528_v0 }
  0x20   : > { %193 = vst [vmem:[%s2587_s25 + $0x60] sm:$0xff] %v2528_v0  ;;  %194 = vst [vmem:[%s2587_s25 + $0x68] sm:$0xff] %v2528_v0 }
  0x21   : > { %195 = vst [vmem:[%s2587_s25 + $0x70] sm:$0xff] %v2528_v0  ;;  %196 = vst [vmem:[%s2587_s25 + $0x78] sm:$0xff] %v2528_v0 }
  0x22 PF: > { %v265_v1 = vld [vmem:[%s2592_s28 + $0x20] sm:$0x11]  ;;  %vm425_vm0 = vcmask 1040384   ;;  %v270_v2 = vld [vmem:[%s2592_s28 + $0x48] sm:$0x11]  ;;  %v2529_v15 = vmov 0  }
  0x23   : > { %v2613_v3 = vcombine.high %v265_v1, %v265_v1  ;;  %v2615_v4 = vcombine.high %v270_v2, %v270_v2  ;;  %v2617_v5 = vcombine.low %v265_v1, %v265_v1  ;;  %v2619_v6 = vcombine.low %v270_v2, %v270_v2  ;;  %v2158_v7 = vld [vmem:[%s2592_s28 + $0x14] ss:$8 sps:$4 sm:$0xff]   ;;  %v2162_v9 = vld [vmem:[%s2592_s28 + $0x10] ss:$8 sps:$4 sm:$0xff]   ;;  %v2630_v13 = vld [vmem:[%s2592_s28 + $0x4] ss:$8 sps:$4 sm:$0xff]   ;;  %464 = vmatprep.mubr.bf16.mxu0 %v2529_v15 }
  0x24   : > { %v2160_v8 = vld [vmem:[%s2592_s28 + $0x3c] ss:$8 sps:$4 sm:$0xff]   ;;  %v2163_v12 = vld [vmem:[%s2592_s28 + $0x38] ss:$8 sps:$4 sm:$0xff]   ;;  %v2633_v14 = vld [vmem:[%s2592_s28 + $0x2c] ss:$8 sps:$4 sm:$0xff]   ;;  %816 = vmatprep.mubr.bf16.mxu1 %v2529_v15 }
  0x25   : > { %3496 = vst [vmem:[#allocation2_spill] sm:$0xff] %v2613_v3  ;;  %3497 = vst [vmem:[#allocation3_spill] sm:$0xff] %v2615_v4  ;;  %2046 = vmatprep.subr.msk.bf16.mxu0 %vm425_vm0, %v2613_v3  ;;  %2085 = vmatprep.subr.msk.bf16.mxu1 %vm425_vm0, %v2615_v4  ;;  %v427_v10 = vsel %vm425_vm0, %v2617_v5, 0  ;;  %v779_v11 = vsel %vm425_vm0, %v2619_v6, 0  ;;  %v2168_v16 = vld [vmem:[%s2592_s28] ss:$8 sps:$4 sm:$0xff]  }
  0x26   : > { %3498 = vst [vmem:[#allocation4_spill] sm:$0xff] %v2617_v5  ;;  %3499 = vst [vmem:[#allocation5_spill] sm:$0xff] %v2619_v6  ;;  %443 = vmatpush1.bf16.msra.mxu0 %v427_v10  ;;  %795 = vmatpush1.bf16.msra.mxu1 %v779_v11  ;;  %v2169_v17 = vld [vmem:[%s2592_s28 + $0x28] ss:$8 sps:$4 sm:$0xff]   ;;  %v2170_v18 = vld [vmem:[%s2582_s21] sm:$0xff]   ;;  %vm376_vm1 = vcmask 277504  }
  0x27   : > { %444 = vmatprep.subr.bf16.mxu0 %v2158_v7  ;;  %796 = vmatprep.subr.bf16.mxu1 %v2160_v8  ;;  %v2171_v19 = vld [vmem:[%s2582_s21 + $0x80] sm:$0xff]   ;;  %v2172_v20 = vld [vmem:[%s2582_s21 + $0x8] sm:$0xff]   ;;  %v2174_v22 = vld [vmem:[%s2582_s21 + $0x10] sm:$0xff]   ;;  %p2106_p8 = scmp.ne.s32.totalorder %s2510_s9, 2 }
  0x28   : > { %v2173_v21 = vld [vmem:[%s2582_s21 + $0x88] sm:$0xff]   ;;  %v2175_v23 = vld [vmem:[%s2582_s21 + $0x90] sm:$0xff]   ;;  %v2176_v24 = vld [vmem:[%s2582_s21 + $0x18] sm:$0xff]  }
  0x29   : > { %v2177_v25 = vld [vmem:[%s2582_s21 + $0x98] sm:$0xff]   ;;  %v2178_v26 = vld [vmem:[%s2582_s21 + $0x20] sm:$0xff]   ;;  %v2180_v28 = vld [vmem:[%s2582_s21 + $0x28] sm:$0xff]  }
  0x2a   : > { %445 = vmatpush1.bf16.msra.mxu0 %v2162_v9  ;;  %797 = vmatpush1.bf16.msra.mxu1 %v2163_v12  ;;  %v2179_v27 = vld [vmem:[%s2582_s21 + $0xa0] sm:$0xff]   ;;  %v2181_v29 = vld [vmem:[%s2582_s21 + $0xa8] sm:$0xff]   ;;  %v2182_v30 = vld [vmem:[%s2582_s21 + $0x30] sm:$0xff]  }
  0x2b   : > { %446 = vmatprep.subr.bf16.mxu0 %v2630_v13  ;;  %798 = vmatprep.subr.bf16.mxu1 %v2633_v14  ;;  %v2183_v31 = vld [vmem:[%s2582_s21 + $0xb0] sm:$0xff]   ;;  %v2184_v32 = vld [vmem:[%s2582_s21 + $0x38] sm:$0xff]   ;;  %v2186_v34 = vld [vmem:[%s2582_s21 + $0x40] sm:$0xff]  }
  0x2c   : > { %v2185_v33 = vld [vmem:[%s2582_s21 + $0xb8] sm:$0xff]   ;;  %v2187_v35 = vld [vmem:[%s2582_s21 + $0xc0] sm:$0xff]   ;;  %v2188_v36 = vld [vmem:[%s2582_s21 + $0x48] sm:$0xff]  }
  0x2d   : > { %v2189_v37 = vld [vmem:[%s2582_s21 + $0xc8] sm:$0xff]   ;;  %v2190_v38 = vld [vmem:[%s2582_s21 + $0x50] sm:$0xff]   ;;  %v2192_v40 = vld [vmem:[%s2582_s21 + $0x58] sm:$0xff]  }
  0x2e   : > { %447 = vmatpush1.bf16.msra.mxu0 %v2168_v16  ;;  %799 = vmatpush1.bf16.msra.mxu1 %v2169_v17  ;;  %v2191_v39 = vld [vmem:[%s2582_s21 + $0xd0] sm:$0xff]   ;;  %v2193_v41 = vld [vmem:[%s2582_s21 + $0xd8] sm:$0xff]   ;;  %v2194_v42 = vld [vmem:[%s2582_s21 + $0x60] sm:$0xff]  }
  0x2f   : > { %v2195_v43 = vld [vmem:[%s2582_s21 + $0xe0] sm:$0xff]   ;;  %v2196_v44 = vld [vmem:[%s2582_s21 + $0x68] sm:$0xff]   ;;  %v2198_v46 = vld [vmem:[%s2582_s21 + $0x70] sm:$0xff]  }
  0x30   : > { %v2197_v45 = vld [vmem:[%s2582_s21 + $0xe8] sm:$0xff]   ;;  %v2199_v47 = vld [vmem:[%s2582_s21 + $0xf0] sm:$0xff]   ;;  %v2200_v48 = vld [vmem:[%s2582_s21 + $0x78] sm:$0xff]  }
  0x31   : > { %2047 = vmatmul.mubr.msk.bf16.vlgmr.msra.gmra.mxu0 %vm376_vm1, %v2170_v18  ;;  %2086 = vmatmul.mubr.msk.bf16.vlgmr.msra.gmra.mxu1 %vm376_vm1, %v2171_v19  ;;  %v2201_v49 = vld [vmem:[%s2582_s21 + $0xf8] sm:$0xff]  }
  0x32   : > { %474 = vmatprep.mubr.bf16.mxu0 %v2529_v15  ;;  %826 = vmatprep.mubr.bf16.mxu1 %v2529_v15 }
  0x39   : > { %2048 = vmatmul.mubr.msk.bf16.gmra.mxu0 %vm376_vm1, %v2172_v20  ;;  %2087 = vmatmul.mubr.msk.bf16.gmra.mxu1 %vm376_vm1, %v2173_v21 }
  0x3a   : > { %484 = vmatprep.mubr.bf16.mxu0 %v2529_v15  ;;  %836 = vmatprep.mubr.bf16.mxu1 %v2529_v15 }
  0x41   : > { %2049 = vmatmul.mubr.msk.bf16.gmra.mxu0 %vm376_vm1, %v2174_v22  ;;  %2088 = vmatmul.mubr.msk.bf16.gmra.mxu1 %vm376_vm1, %v2175_v23 }
  0x42   : > { %494 = vmatprep.mubr.bf16.mxu0 %v2529_v15  ;;  %846 = vmatprep.mubr.bf16.mxu1 %v2529_v15 }
  0x49   : > { %2050 = vmatmul.mubr.msk.bf16.gmra.mxu0 %vm376_vm1, %v2176_v24  ;;  %2089 = vmatmul.mubr.msk.bf16.gmra.mxu1 %vm376_vm1, %v2177_v25 }
  0x4a   : > { %504 = vmatprep.mubr.bf16.mxu0 %v2529_v15  ;;  %856 = vmatprep.mubr.bf16.mxu1 %v2529_v15 }
  0x51   : > { %2051 = vmatmul.mubr.msk.bf16.gmra.mxu0 %vm376_vm1, %v2178_v26  ;;  %2090 = vmatmul.mubr.msk.bf16.gmra.mxu1 %vm376_vm1, %v2179_v27 }
  0x52   : > { %514 = vmatprep.mubr.bf16.mxu0 %v2529_v15  ;;  %866 = vmatprep.mubr.bf16.mxu1 %v2529_v15 }
  0x59   : > { %2052 = vmatmul.mubr.msk.bf16.gmra.mxu0 %vm376_vm1, %v2180_v28  ;;  %2091 = vmatmul.mubr.msk.bf16.gmra.mxu1 %vm376_vm1, %v2181_v29 }
  0x5a   : > { %524 = vmatprep.mubr.bf16.mxu0 %v2529_v15  ;;  %876 = vmatprep.mubr.bf16.mxu1 %v2529_v15 }
  0x61   : > { %2053 = vmatmul.mubr.msk.bf16.gmra.mxu0 %vm376_vm1, %v2182_v30  ;;  %2092 = vmatmul.mubr.msk.bf16.gmra.mxu1 %vm376_vm1, %v2183_v31 }
  0x62   : > { %534 = vmatprep.mubr.bf16.mxu0 %v2529_v15  ;;  %886 = vmatprep.mubr.bf16.mxu1 %v2529_v15 }
  0x69   : > { %2054 = vmatmul.mubr.msk.bf16.gmra.mxu0 %vm376_vm1, %v2184_v32  ;;  %2093 = vmatmul.mubr.msk.bf16.gmra.mxu1 %vm376_vm1, %v2185_v33 }
  0x6a   : > { %544 = vmatprep.mubr.bf16.mxu0 %v2529_v15  ;;  %896 = vmatprep.mubr.bf16.mxu1 %v2529_v15 }
  0x71   : > { %2055 = vmatmul.mubr.msk.bf16.gmra.mxu0 %vm376_vm1, %v2186_v34  ;;  %2094 = vmatmul.mubr.msk.bf16.gmra.mxu1 %vm376_vm1, %v2187_v35 }
  0x72   : > { %554 = vmatprep.mubr.bf16.mxu0 %v2529_v15  ;;  %906 = vmatprep.mubr.bf16.mxu1 %v2529_v15 }
  0x79   : > { %2056 = vmatmul.mubr.msk.bf16.gmra.mxu0 %vm376_vm1, %v2188_v36  ;;  %2095 = vmatmul.mubr.msk.bf16.gmra.mxu1 %vm376_vm1, %v2189_v37 }
  0x7a   : > { %564 = vmatprep.mubr.bf16.mxu0 %v2529_v15  ;;  %916 = vmatprep.mubr.bf16.mxu1 %v2529_v15 }
  0x81   : > { %2057 = vmatmul.mubr.msk.bf16.gmra.mxu0 %vm376_vm1, %v2190_v38  ;;  %2096 = vmatmul.mubr.msk.bf16.gmra.mxu1 %vm376_vm1, %v2191_v39 }
  0x82   : > { %574 = vmatprep.mubr.bf16.mxu0 %v2529_v15  ;;  %926 = vmatprep.mubr.bf16.mxu1 %v2529_v15 }
  0x89   : > { %2058 = vmatmul.mubr.msk.bf16.gmra.mxu0 %vm376_vm1, %v2192_v40  ;;  %2097 = vmatmul.mubr.msk.bf16.gmra.mxu1 %vm376_vm1, %v2193_v41 }
  0x8a   : > { %584 = vmatprep.mubr.bf16.mxu0 %v2529_v15  ;;  %936 = vmatprep.mubr.bf16.mxu1 %v2529_v15 }
  0x91   : > { %2059 = vmatmul.mubr.msk.bf16.gmra.mxu0 %vm376_vm1, %v2194_v42  ;;  %2098 = vmatmul.mubr.msk.bf16.gmra.mxu1 %vm376_vm1, %v2195_v43 }
  0x92   : > { %594 = vmatprep.mubr.bf16.mxu0 %v2529_v15  ;;  %946 = vmatprep.mubr.bf16.mxu1 %v2529_v15 }
  0x99   : > { %2060 = vmatmul.mubr.msk.bf16.gmra.mxu0 %vm376_vm1, %v2196_v44  ;;  %2099 = vmatmul.mubr.msk.bf16.gmra.mxu1 %vm376_vm1, %v2197_v45 }
  0x9a   : > { %604 = vmatprep.mubr.bf16.mxu0 %v2529_v15  ;;  %956 = vmatprep.mubr.bf16.mxu1 %v2529_v15 }
  0xa1   : > { %2061 = vmatmul.mubr.msk.bf16.gmra.mxu0 %vm376_vm1, %v2198_v46  ;;  %2100 = vmatmul.mubr.msk.bf16.gmra.mxu1 %vm376_vm1, %v2199_v47 }
  0xa2   : > { %614 = vmatprep.mubr.bf16.mxu0 %v2529_v15  ;;  %966 = vmatprep.mubr.bf16.mxu1 %v2529_v15 }
  0xa9   : > { %2062 = vmatmul.mubr.msk.bf16.gmra.mxu0 %vm376_vm1, %v2200_v48  ;;  %2101 = vmatmul.mubr.msk.bf16.gmra.mxu1 %vm376_vm1, %v2201_v49 }
  0xaa   : > { %1651 = vmatprep.mubr.bf16.mxu0 %v2630_v13  ;;  %1714 = vmatprep.mubr.bf16.mxu1 %v2633_v14 }
  0xf1   : > { %v2737_v50 = vpop.f32.mrf.mxu0  ;;  %v2739_v51 = vpop.f32.mrf.mxu1 }
  0xf2   : > { %3500 = vst [vmem:[#allocation6_spill] sm:$0xff] %v2737_v50  ;;  %3501 = vst [vmem:[#allocation7_spill] sm:$0xff] %v2739_v51 }
  0xf3   : > { %v2741_v52 = vpop.f32.mrf.mxu0  ;;  %v2743_v53 = vpop.f32.mrf.mxu1 }
  0xf4   : > { %3502 = vst [vmem:[#allocation8_spill] sm:$0xff] %v2741_v52  ;;  %3503 = vst [vmem:[#allocation9_spill] sm:$0xff] %v2743_v53 }
  0xf5   : > { %v2745_v54 = vpop.f32.mrf.mxu0  ;;  %v2747_v55 = vpop.f32.mrf.mxu1 }
  0xf6   : > { %3504 = vst [vmem:[#allocation10_spill] sm:$0xff] %v2745_v54  ;;  %3505 = vst [vmem:[#allocation11_spill] sm:$0xff] %v2747_v55 }
  0xf7   : > { %v2749_v56 = vpop.f32.mrf.mxu0  ;;  %v2751_v57 = vpop.f32.mrf.mxu1 }
  0xf8   : > { %3506 = vst [vmem:[#allocation12_spill] sm:$0xff] %v2749_v56  ;;  %3507 = vst [vmem:[#allocation13_spill] sm:$0xff] %v2751_v57 }
  0xf9   : > { %v2753_v58 = vpop.f32.mrf.mxu0  ;;  %v2755_v59 = vpop.f32.mrf.mxu1 }
  0xfa   : > { %3508 = vst [vmem:[#allocation14_spill] sm:$0xff] %v2753_v58  ;;  %3509 = vst [vmem:[#allocation15_spill] sm:$0xff] %v2755_v59 }
  0xfb   : > { %v2757_v60 = vpop.f32.mrf.mxu0  ;;  %v2759_v61 = vpop.f32.mrf.mxu1 }
  0xfc   : > { %3510 = vst [vmem:[#allocation16_spill] sm:$0xff] %v2757_v60  ;;  %3511 = vst [vmem:[#allocation17_spill] sm:$0xff] %v2759_v61 }
  0xfd   : > { %v2761_v62 = vpop.f32.mrf.mxu0  ;;  %v2763_v63 = vpop.f32.mrf.mxu1 }
  0xfe   : > { %3512 = vst [vmem:[#allocation18_spill] sm:$0xff] %v2761_v62  ;;  %3513 = vst [vmem:[#allocation19_spill] sm:$0xff] %v2763_v63 }
  0xff   : > { %v2765_v0 = vpop.f32.mrf.mxu0  ;;  %v2767_v1 = vpop.f32.mrf.mxu1 }
 0x100   : > { %3514 = vst [vmem:[#allocation20_spill] sm:$0xff] %v2765_v0  ;;  %3515 = vst [vmem:[#allocation21_spill] sm:$0xff] %v2767_v1 }
 0x101   : > { %v2769_v2 = vpop.f32.mrf.mxu0  ;;  %v2771_v7 = vpop.f32.mrf.mxu1 }
 0x102   : > { %3516 = vst [vmem:[#allocation22_spill] sm:$0xff] %v2769_v2  ;;  %3517 = vst [vmem:[#allocation23_spill] sm:$0xff] %v2771_v7 }
 0x103   : > { %v2773_v8 = vpop.f32.mrf.mxu0  ;;  %v2775_v9 = vpop.f32.mrf.mxu1 }
 0x104   : > { %3518 = vst [vmem:[#allocation24_spill] sm:$0xff] %v2773_v8  ;;  %3519 = vst [vmem:[#allocation25_spill] sm:$0xff] %v2775_v9 }
 0x105   : > { %v2777_v10 = vpop.f32.mrf.mxu0  ;;  %v2779_v11 = vpop.f32.mrf.mxu1 }
 0x106   : > { %3520 = vst [vmem:[#allocation26_spill] sm:$0xff] %v2777_v10  ;;  %3521 = vst [vmem:[#allocation27_spill] sm:$0xff] %v2779_v11 }
 0x107   : > { %v2781_v12 = vpop.f32.mrf.mxu0  ;;  %v2783_v13 = vpop.f32.mrf.mxu1 }
 0x108   : > { %3522 = vst [vmem:[#allocation28_spill] sm:$0xff] %v2781_v12  ;;  %3523 = vst [vmem:[#allocation29_spill] sm:$0xff] %v2783_v13 }
 0x109   : > { %v2785_v14 = vpop.f32.mrf.mxu0  ;;  %v2787_v15 = vpop.f32.mrf.mxu1 }
 0x10a   : > { %3524 = vst [vmem:[#allocation30_spill] sm:$0xff] %v2785_v14  ;;  %3525 = vst [vmem:[#allocation31_spill] sm:$0xff] %v2787_v15 }
 0x10b   : > { %v2789_v16 = vpop.f32.mrf.mxu0  ;;  %v2791_v17 = vpop.f32.mrf.mxu1 }
 0x10c   : > { %3526 = vst [vmem:[#allocation32_spill] sm:$0xff] %v2789_v16  ;;  %3527 = vst [vmem:[#allocation33_spill] sm:$0xff] %v2791_v17 }
 0x10d   : > { %v2793_v18 = vpop.f32.mrf.mxu0  ;;  %v2795_v19 = vpop.f32.mrf.mxu1 }
 0x10e   : > { %3528 = vst [vmem:[#allocation34_spill] sm:$0xff] %v2793_v18  ;;  %3529 = vst [vmem:[#allocation35_spill] sm:$0xff] %v2795_v19 }
 0x10f   : > { %v2797_v20 = vpop.f32.mrf.mxu0  ;;  %v2799_v21 = vpop.f32.mrf.mxu1 }
 0x110   : > { %3530 = vst [vmem:[#allocation36_spill] sm:$0xff] %v2797_v20  ;;  %3531 = vst [vmem:[#allocation37_spill] sm:$0xff] %v2799_v21 }
 0x111   : > { %v2801_v22 = vpop.f32.mrf.mxu0  ;;  %v2803_v23 = vpop.f32.mrf.mxu1 }
 0x112   : > { %3532 = vst [vmem:[#allocation38_spill] sm:$0xff] %v2801_v22  ;;  %3533 = vst [vmem:[#allocation39_spill] sm:$0xff] %v2803_v23 }
 0x113   : > { %v2805_v24 = vpop.f32.mrf.mxu0  ;;  %v2807_v25 = vpop.f32.mrf.mxu1 }
 0x114   : > { %3534 = vst [vmem:[#allocation40_spill] sm:$0xff] %v2805_v24  ;;  %3535 = vst [vmem:[#allocation41_spill] sm:$0xff] %v2807_v25 }
 0x115   : > { %v2809_v26 = vpop.f32.mrf.mxu0  ;;  %v2811_v27 = vpop.f32.mrf.mxu1 }
 0x116   : > { %3536 = vst [vmem:[#allocation42_spill] sm:$0xff] %v2809_v26  ;;  %3537 = vst [vmem:[#allocation43_spill] sm:$0xff] %v2811_v27 }
 0x117   : > { %v2813_v28 = vpop.f32.mrf.mxu0  ;;  %v2815_v29 = vpop.f32.mrf.mxu1 }
 0x118   : > { %3538 = vst [vmem:[#allocation44_spill] sm:$0xff] %v2813_v28  ;;  %3539 = vst [vmem:[#allocation45_spill] sm:$0xff] %v2815_v29 }
 0x119   : > { %v2817_v30 = vpop.f32.mrf.mxu0  ;;  %v2819_v31 = vpop.f32.mrf.mxu1 }
 0x11a   : > { %3540 = vst [vmem:[#allocation46_spill] sm:$0xff] %v2817_v30  ;;  %3541 = vst [vmem:[#allocation47_spill] sm:$0xff] %v2819_v31 }
 0x11b   : > { %v2821_v32 = vpop.f32.mrf.mxu0  ;;  %v2823_v33 = vpop.f32.mrf.mxu1 }
 0x11c   : > { %3542 = vst [vmem:[#allocation48_spill] sm:$0xff] %v2821_v32  ;;  %3543 = vst [vmem:[#allocation49_spill] sm:$0xff] %v2823_v33 }
 0x11d   : > { %v2825_v34 = vpop.f32.mrf.mxu0  ;;  %v2827_v35 = vpop.f32.mrf.mxu1 }
 0x11e   : > { %3544 = vst [vmem:[#allocation50_spill] sm:$0xff] %v2825_v34  ;;  %3545 = vst [vmem:[#allocation51_spill] sm:$0xff] %v2827_v35 }
 0x11f   : > { %v2829_v36 = vpop.f32.mrf.mxu0  ;;  %v2831_v37 = vpop.f32.mrf.mxu1 }
 0x120   : > { %3546 = vst [vmem:[#allocation52_spill] sm:$0xff] %v2829_v36  ;;  %3547 = vst [vmem:[#allocation53_spill] sm:$0xff] %v2831_v37 }
 0x121   : > { %v2833_v38 = vpop.f32.mrf.mxu0  ;;  %v2835_v39 = vpop.f32.mrf.mxu1 }
 0x122   : > { %3548 = vst [vmem:[#allocation54_spill] sm:$0xff] %v2833_v38  ;;  %3549 = vst [vmem:[#allocation55_spill] sm:$0xff] %v2835_v39 }
 0x123   : > { %v2837_v40 = vpop.f32.mrf.mxu0  ;;  %v2839_v41 = vpop.f32.mrf.mxu1 }
 0x124   : > { %3550 = vst [vmem:[#allocation56_spill] sm:$0xff] %v2837_v40  ;;  %3551 = vst [vmem:[#allocation57_spill] sm:$0xff] %v2839_v41 }
 0x125   : > { %v2841_v42 = vpop.f32.mrf.mxu0  ;;  %v2843_v43 = vpop.f32.mrf.mxu1 }
 0x126   : > { %3552 = vst [vmem:[#allocation58_spill] sm:$0xff] %v2841_v42  ;;  %3553 = vst [vmem:[#allocation59_spill] sm:$0xff] %v2843_v43 }
 0x127   : > { %v2845_v44 = vpop.f32.mrf.mxu0  ;;  %v2847_v45 = vpop.f32.mrf.mxu1 }
 0x128   : > { %3554 = vst [vmem:[#allocation60_spill] sm:$0xff] %v2845_v44  ;;  %3555 = vst [vmem:[#allocation61_spill] sm:$0xff] %v2847_v45 }
 0x129   : > { %v2849_v46 = vpop.f32.mrf.mxu0  ;;  %v2851_v47 = vpop.f32.mrf.mxu1 }
 0x12a   : > { %3556 = vst [vmem:[#allocation62_spill] sm:$0xff] %v2849_v46  ;;  %3557 = vst [vmem:[#allocation63_spill] sm:$0xff] %v2851_v47 }
 0x12b   : > { %v2853_v48 = vpop.f32.mrf.mxu0  ;;  %v2855_v49 = vpop.f32.mrf.mxu1 }
 0x12c   : > { %3558 = vst [vmem:[#allocation64_spill] sm:$0xff] %v2853_v48  ;;  %3559 = vst [vmem:[#allocation65_spill] sm:$0xff] %v2855_v49  ;;  %v1115_v6 = vmax.f32 %v2851_v47, %v2855_v49  ;;  %v1019_v5 = vmax.f32 %v2849_v46, %v2853_v48  ;;  %v1013_v46 = vmax.f32 %v2833_v38, %v2837_v40 }
 0x12d   : > { %v2861_v4 = vpop.f32.mrf.mxu0  ;;  %v2863_v3 = vpop.f32.mrf.mxu1  ;;  %v1007_v38 = vmax.f32 %v2817_v30, %v2821_v32  ;;  %v1001_v30 = vmax.f32 %v2801_v22, %v2805_v24  ;;  %v995_v22 = vmax.f32 %v2785_v14, %v2789_v16  ;;  %v989_v14 = vmax.f32 %v2769_v2, %v2773_v8 }
 0x12e   : > { %3560 = vst [vmem:[#allocation66_spill] sm:$0xff] %v2861_v4  ;;  %3561 = vst [vmem:[#allocation67_spill] sm:$0xff] %v2863_v3  ;;  %1116 = vmax.xlane.f32.xlu1 %v1115_v6  ;;  %1020 = vmax.xlane.f32.xlu0 %v1019_v5  ;;  %v1016_v5 = vmax.f32 %v2841_v42, %v2845_v44  ;;  %v983_v2 = vmax.f32 %v2753_v58, %v2757_v60 }
 0x12f   : > { %v2865_v51 = vpop.f32.mrf.mxu0  ;;  %v2867_v53 = vpop.f32.mrf.mxu1  ;;  %v977_v58 = vmax.f32 %v2737_v50, %v2741_v52 }
 0x130   : > { %3562 = vst [vmem:[#allocation68_spill] sm:$0xff] %v2865_v51  ;;  %3563 = vst [vmem:[#allocation69_spill] sm:$0xff] %v2867_v53  ;;  %v1118_v55 = vmax.f32 %v2863_v3, %v2867_v53  ;;  %v1022_v57 = vmax.f32 %v2861_v4, %v2865_v51  ;;  %v1109_v4 = vmax.f32 %v2835_v39, %v2839_v41 }
 0x131   : > { %v2873_v49 = vpop.f32.mrf.mxu0  ;;  %v2875_v47 = vpop.f32.mrf.mxu1  ;;  %v1103_v39 = vmax.f32 %v2819_v31, %v2823_v33  ;;  %v1097_v31 = vmax.f32 %v2803_v23, %v2807_v25  ;;  %v1091_v23 = vmax.f32 %v2787_v15, %v2791_v17  ;;  %v1085_v15 = vmax.f32 %v2771_v7, %v2775_v9 }
 0x132   : > { %3564 = vst [vmem:[#allocation70_spill] sm:$0xff] %v2873_v49  ;;  %3565 = vst [vmem:[#allocation71_spill] sm:$0xff] %v2875_v47  ;;  %1119 = vmax.xlane.f32.xlu1 %v1118_v55  ;;  %1023 = vmax.xlane.f32.xlu0 %v1022_v57  ;;  %v1112_v57 = vmax.f32 %v2843_v43, %v2847_v45  ;;  %v1079_v7 = vmax.f32 %v2755_v59, %v2759_v61  ;;  %v3593_v59 = vld [vmem:[#allocation11_spill] sm:$0xff] }
 0x133   : > { %v2877_v48 = vpop.f32.mrf.mxu0  ;;  %v2879_v6 = vpop.f32.mrf.mxu1 }
 0x134   : > { %3566 = vst [vmem:[#allocation72_spill] sm:$0xff] %v2877_v48  ;;  %3567 = vst [vmem:[#allocation73_spill] sm:$0xff] %v2879_v6 }
 0x135   : > { %v2885_v53 = vpop.f32.mrf.mxu0  ;;  %v2887_v3 = vpop.f32.mrf.mxu1 }
 0x136   : > { %3568 = vst [vmem:[#allocation74_spill] sm:$0xff] %v2885_v53  ;;  %3569 = vst [vmem:[#allocation75_spill] sm:$0xff] %v2887_v3  ;;  %1017 = vmax.xlane.f32.xlu1 %v1016_v5  ;;  %1014 = vmax.xlane.f32.xlu0 %v1013_v46  ;;  %v1010_v46 = vmax.f32 %v2825_v34, %v2829_v36  ;;  %v3595_v53 = vld [vmem:[#allocation7_spill] sm:$0xff] }
 0x137   : > { %v2889_v51 = vpop.f32.mrf.mxu0  ;;  %v2891_v55 = vpop.f32.mrf.mxu1 }
 0x138   : > { %3570 = vst [vmem:[#allocation76_spill] sm:$0xff] %v2889_v51  ;;  %3571 = vst [vmem:[#allocation77_spill] sm:$0xff] %v2891_v55  ;;  %v3594_v55 = vld [vmem:[#allocation9_spill] sm:$0xff] }
 0x139   : > { %v2897_v44 = vpop.f32.mrf.mxu0  ;;  %v2899_v42 = vpop.f32.mrf.mxu1  ;;  %v1073_v51 = vmax.f32 %v3595_v53, %v3594_v55 }
 0x13a   : > { %3572 = vst [vmem:[#allocation78_spill] sm:$0xff] %v2897_v44  ;;  %3573 = vst [vmem:[#allocation79_spill] sm:$0xff] %v2899_v42  ;;  %1113 = vmax.xlane.f32.xlu1 %v1112_v57  ;;  %1110 = vmax.xlane.f32.xlu0 %v1109_v4  ;;  %v1106_v4 = vmax.f32 %v2827_v35, %v2831_v37 }
 0x13b   : > { %v2901_v40 = vpop.f32.mrf.mxu0  ;;  %v2903_v5 = vpop.f32.mrf.mxu1 }
 0x13c   : > { %3574 = vst [vmem:[#allocation80_spill] sm:$0xff] %v2901_v40  ;;  %3575 = vst [vmem:[#allocation81_spill] sm:$0xff] %v2903_v5 }
 0x13d   : > { %v2909_v45 = vpop.f32.mrf.mxu0  ;;  %v2911_v43 = vpop.f32.mrf.mxu1 }
 0x13e   : > { %3576 = vst [vmem:[#allocation82_spill] sm:$0xff] %v2909_v45  ;;  %3577 = vst [vmem:[#allocation83_spill] sm:$0xff] %v2911_v43  ;;  %1011 = vmax.xlane.f32.xlu1 %v1010_v46  ;;  %1008 = vmax.xlane.f32.xlu0 %v1007_v38  ;;  %v1004_v38 = vmax.f32 %v2809_v26, %v2813_v28 }
 0x13f   : > { %v2913_v41 = vpop.f32.mrf.mxu0  ;;  %v2915_v57 = vpop.f32.mrf.mxu1 }
 0x140   : > { %3578 = vst [vmem:[#allocation84_spill] sm:$0xff] %v2913_v41  ;;  %3579 = vst [vmem:[#allocation85_spill] sm:$0xff] %v2915_v57 }
 0x141   : > { %v2921_v36 = vpop.f32.mrf.mxu0  ;;  %v2923_v34 = vpop.f32.mrf.mxu1 }
 0x142   : > { %3580 = vst [vmem:[#allocation86_spill] sm:$0xff] %v2921_v36  ;;  %3581 = vst [vmem:[#allocation87_spill] sm:$0xff] %v2923_v34  ;;  %1107 = vmax.xlane.f32.xlu1 %v1106_v4  ;;  %1104 = vmax.xlane.f32.xlu0 %v1103_v39  ;;  %v1100_v39 = vmax.f32 %v2811_v27, %v2815_v29 }
 0x143   : > { %v2925_v32 = vpop.f32.mrf.mxu0  ;;  %v2927_v46 = vpop.f32.mrf.mxu1 }
 0x144   : > { %3582 = vst [vmem:[#allocation88_spill] sm:$0xff] %v2925_v32  ;;  %3583 = vst [vmem:[#allocation89_spill] sm:$0xff] %v2927_v46 }
 0x145   : > { %v2933_v37 = vpop.f32.mrf.mxu0  ;;  %v2935_v35 = vpop.f32.mrf.mxu1 }
 0x146   : > { %3584 = vst [vmem:[#allocation90_spill] sm:$0xff] %v2933_v37  ;;  %3585 = vst [vmem:[#allocation91_spill] sm:$0xff] %v2935_v35  ;;  %1005 = vmax.xlane.f32.xlu1 %v1004_v38  ;;  %1002 = vmax.xlane.f32.xlu0 %v1001_v30  ;;  %v998_v30 = vmax.f32 %v2793_v18, %v2797_v20 }
 0x147   : > { %v2937_v33 = vpop.f32.mrf.mxu0  ;;  %v2939_v4 = vpop.f32.mrf.mxu1 }
 0x148   : > { %3586 = vst [vmem:[#allocation92_spill] sm:$0xff] %v2937_v33  ;;  %3587 = vst [vmem:[#allocation93_spill] sm:$0xff] %v2939_v4 }
 0x149   : > { %v2945_v28 = vpop.f32.mrf.mxu0  ;;  %v2947_v26 = vpop.f32.mrf.mxu1 }
 0x14a   : > { %1101 = vmax.xlane.f32.xlu1 %v1100_v39  ;;  %1098 = vmax.xlane.f32.xlu0 %v1097_v31  ;;  %v1094_v31 = vmax.f32 %v2795_v19, %v2799_v21 }
 0x14b   : > { %v2949_v24 = vpop.f32.mrf.mxu0  ;;  %v2951_v38 = vpop.f32.mrf.mxu1 }
 0x14d   : > { %v2957_v29 = vpop.f32.mrf.mxu0  ;;  %v2959_v27 = vpop.f32.mrf.mxu1 }
 0x14e   : > { %3588 = vst [vmem:[#allocation94_spill] sm:$0xff] %v2957_v29  ;;  %3589 = vst [vmem:[#allocation95_spill] sm:$0xff] %v2959_v27  ;;  %999 = vmax.xlane.f32.xlu1 %v998_v30  ;;  %996 = vmax.xlane.f32.xlu0 %v995_v22  ;;  %v992_v22 = vmax.f32 %v2777_v10, %v2781_v12 }
 0x14f   : > { %v2961_v25 = vpop.f32.mrf.mxu0  ;;  %v2963_v39 = vpop.f32.mrf.mxu1 }
 0x150   : > { %3590 = vst [vmem:[#allocation96_spill] sm:$0xff] %v2961_v25  ;;  %3591 = vst [vmem:[#allocation97_spill] sm:$0xff] %v2963_v39 }
 0x151   : > { %v2969_v20 = vpop.f32.mrf.mxu0  ;;  %v2971_v18 = vpop.f32.mrf.mxu1 }
 0x152   : > { %1095 = vmax.xlane.f32.xlu1 %v1094_v31  ;;  %1092 = vmax.xlane.f32.xlu0 %v1091_v23  ;;  %v1088_v23 = vmax.f32 %v2779_v11, %v2783_v13 }
 0x153   : > { %v2973_v16 = vpop.f32.mrf.mxu0  ;;  %v2975_v30 = vpop.f32.mrf.mxu1 }
 0x155   : > { %v2981_v21 = vpop.f32.mrf.mxu0  ;;  %v2983_v19 = vpop.f32.mrf.mxu1 }
 0x156   : > { %993 = vmax.xlane.f32.xlu1 %v992_v22  ;;  %990 = vmax.xlane.f32.xlu0 %v989_v14  ;;  %v986_v14 = vmax.f32 %v2761_v62, %v2765_v0 }
 0x157   : > { %v2985_v17 = vpop.f32.mrf.mxu0  ;;  %v2987_v31 = vpop.f32.mrf.mxu1 }
 0x159   : > { %v2993_v12 = vpop.f32.mrf.mxu0  ;;  %v2995_v10 = vpop.f32.mrf.mxu1 }
 0x15a   : > { %1089 = vmax.xlane.f32.xlu1 %v1088_v23  ;;  %1086 = vmax.xlane.f32.xlu0 %v1085_v15  ;;  %v1082_v15 = vmax.f32 %v2763_v63, %v2767_v1 }
 0x15b   : > { %v2997_v8 = vpop.f32.mrf.mxu0  ;;  %v2999_v22 = vpop.f32.mrf.mxu1 }
 0x15d   : > { %v3005_v13 = vpop.f32.mrf.mxu0  ;;  %v3007_v11 = vpop.f32.mrf.mxu1 }
 0x15e   : > { %987 = vmax.xlane.f32.xlu1 %v986_v14  ;;  %984 = vmax.xlane.f32.xlu0 %v983_v2  ;;  %v980_v2 = vmax.f32 %v2745_v54, %v2749_v56 }
 0x15f   : > { %v3009_v9 = vpop.f32.mrf.mxu0  ;;  %v3011_v23 = vpop.f32.mrf.mxu1 }
 0x161   : > { %v3017_v0 = vpop.f32.mrf.mxu0  ;;  %v3019_v62 = vpop.f32.mrf.mxu1 }
 0x162   : > { %1083 = vmax.xlane.f32.xlu1 %v1082_v15  ;;  %1080 = vmax.xlane.f32.xlu0 %v1079_v7  ;;  %v3592_v7 = vld [vmem:[#allocation13_spill] sm:$0xff] }
 0x163   : > { %v3021_v60 = vpop.f32.mrf.mxu0  ;;  %v3023_v14 = vpop.f32.mrf.mxu1  ;;  %v1076_v3 = vmax.f32 %v3593_v59, %v3592_v7 }
 0x165   : > { %v3029_v1 = vpop.f32.mrf.mxu0  ;;  %v3031_v63 = vpop.f32.mrf.mxu1 }
 0x166   : > { %981 = vmax.xlane.f32.xlu1 %v980_v2  ;;  %978 = vmax.xlane.f32.xlu0 %v977_v58 }
 0x167   : > { %v3033_v61 = vpop.f32.mrf.mxu0  ;;  %v3035_v15 = vpop.f32.mrf.mxu1 }
 0x169   : > { %v3041_v56 = vpop.f32.mrf.mxu0  ;;  %v3043_v54 = vpop.f32.mrf.mxu1 }
 0x16a   : > { %3596 = vst [vmem:[#allocation11_spill] sm:$0xff] %v3041_v56  ;;  %1077 = vmax.xlane.f32.xlu1 %v1076_v3  ;;  %1074 = vmax.xlane.f32.xlu0 %v1073_v51 }
 0x16b   : > { %v3045_v52 = vpop.f32.mrf.mxu0  ;;  %v3047_v2 = vpop.f32.mrf.mxu1 }
 0x16c   : > { %3597 = vst [vmem:[#allocation7_spill] sm:$0xff] %v3045_v52  ;;  %3598 = vst [vmem:[#allocation98_spill] sm:$0xff] %v3047_v2  ;;  %v1067_v58 = vmax.f32 %v3041_v56, %v3045_v52  ;;  %v1163_v55 = vmax.f32 %v3043_v54, %v3047_v2  ;;  %v1061_v52 = vmax.f32 %v3017_v0, %v3021_v60 }
 0x16d   : > { %v3051_v50 = vpop.f32.mrf.mxu0  ;;  %v3053_v47 = vpop.f32.mrf.mxu1  ;;  %v1064_v2 = vmax.f32 %v3029_v1, %v3033_v61 }
 0x16e   : > { %1068 = vmax.xlane.f32.xlu0 %v1067_v58  ;;  %v1157_v58 = vmax.f32 %v3019_v62, %v3023_v14 }
 0x16f   : > { %v3055_v7 = vpop.f32.mrf.mxu0  ;;  %v3061_v51 = vpop.f32.mrf.mxu1 }
 0x170   : > { %v1070_v3 = vmax.f32 %v3051_v50, %v3055_v7  ;;  %v1166_v56 = vmax.f32 %v3053_v47, %v3061_v51 }
 0x172   : > { %1164 = vmax.xlane.f32.xlu0 %v1163_v55  ;;  %1071 = vmax.xlane.f32.xlu1 %v1070_v3  ;;  %v1055_v55 = vmax.f32 %v2993_v12, %v2997_v8  ;;  %v1160_v3 = vmax.f32 %v3031_v63, %v3035_v15 }
 0x176   : > { %1062 = vmax.xlane.f32.xlu0 %v1061_v52  ;;  %1167 = vmax.xlane.f32.xlu1 %v1166_v56  ;;  %v1151_v52 = vmax.f32 %v2995_v10, %v2999_v22  ;;  %v1058_v56 = vmax.f32 %v3005_v13, %v3009_v9 }
 0x17a   : > { %1158 = vmax.xlane.f32.xlu0 %v1157_v58  ;;  %1065 = vmax.xlane.f32.xlu1 %v1064_v2  ;;  %v1049_v58 = vmax.f32 %v2969_v20, %v2973_v16  ;;  %v1154_v2 = vmax.f32 %v3007_v11, %v3011_v23 }
 0x17e   : > { %1056 = vmax.xlane.f32.xlu0 %v1055_v55  ;;  %1161 = vmax.xlane.f32.xlu1 %v1160_v3  ;;  %v1145_v55 = vmax.f32 %v2971_v18, %v2975_v30  ;;  %v1052_v3 = vmax.f32 %v2981_v21, %v2985_v17 }
 0x182   : > { %1152 = vmax.xlane.f32.xlu0 %v1151_v52  ;;  %1059 = vmax.xlane.f32.xlu1 %v1058_v56  ;;  %v1043_v52 = vmax.f32 %v2945_v28, %v2949_v24  ;;  %v1148_v56 = vmax.f32 %v2983_v19, %v2987_v31 }
 0x186   : > { %1050 = vmax.xlane.f32.xlu0 %v1049_v58  ;;  %1155 = vmax.xlane.f32.xlu1 %v1154_v2  ;;  %v1139_v58 = vmax.f32 %v2947_v26, %v2951_v38  ;;  %v1046_v2 = vmax.f32 %v2957_v29, %v2961_v25  ;;  %v3630_v29 = vld [vmem:[#allocation38_spill] sm:$0xff] }
 0x18a   : > { %1146 = vmax.xlane.f32.xlu0 %v1145_v55  ;;  %1053 = vmax.xlane.f32.xlu1 %v1052_v3  ;;  %v1037_v55 = vmax.f32 %v2921_v36, %v2925_v32  ;;  %v1142_v3 = vmax.f32 %v2959_v27, %v2963_v39  ;;  %v3626_v39 = vld [vmem:[#allocation47_spill] sm:$0xff] }
 0x18e   : > { %1044 = vmax.xlane.f32.xlu0 %v1043_v52  ;;  %1149 = vmax.xlane.f32.xlu1 %v1148_v56  ;;  %v1133_v52 = vmax.f32 %v2923_v34, %v2927_v46  ;;  %v1040_v56 = vmax.f32 %v2933_v37, %v2937_v33  ;;  %v3610_v37 = vld [vmem:[#allocation66_spill] sm:$0xff] }
 0x18f   : > { %v3614_v34 = vld [vmem:[#allocation54_spill] sm:$0xff] }
 0x192   : > { %1140 = vmax.xlane.f32.xlu0 %v1139_v58  ;;  %1047 = vmax.xlane.f32.xlu1 %v1046_v2  ;;  %v1031_v58 = vmax.f32 %v2897_v44, %v2901_v40  ;;  %v1136_v2 = vmax.f32 %v2935_v35, %v2939_v4  ;;  %v3599_v4 = vld [vmem:[#allocation71_spill] sm:$0xff]  ;;  %v3601_v35 = vld [vmem:[#allocation74_spill] sm:$0xff] }
 0x196   : > { %1038 = vmax.xlane.f32.xlu0 %v1037_v55  ;;  %1143 = vmax.xlane.f32.xlu1 %v1142_v3  ;;  %v1127_v55 = vmax.f32 %v2899_v42, %v2903_v5  ;;  %v1034_v3 = vmax.f32 %v2909_v45, %v2913_v41  ;;  %v3602_v5 = vld [vmem:[#allocation77_spill] sm:$0xff]  ;;  %v3603_v41 = vld [vmem:[#allocation75_spill] sm:$0xff] }
 0x197   : > { %v3605_v42 = vld [vmem:[#allocation65_spill] sm:$0xff] }
 0x19a   : > { %1134 = vmax.xlane.f32.xlu0 %v1133_v52  ;;  %1041 = vmax.xlane.f32.xlu1 %v1040_v56  ;;  %v1025_v52 = vmax.f32 %v2873_v49, %v2877_v48  ;;  %v1130_v56 = vmax.f32 %v2911_v43, %v2915_v57  ;;  %v3604_v48 = vld [vmem:[#allocation63_spill] sm:$0xff]  ;;  %v3607_v43 = vld [vmem:[#allocation64_spill] sm:$0xff] }
 0x19e   : > { %1032 = vmax.xlane.f32.xlu0 %v1031_v58  ;;  %1137 = vmax.xlane.f32.xlu1 %v1136_v2  ;;  %v1121_v58 = vmax.f32 %v3599_v4, %v2879_v6  ;;  %v3600_v2 = vld [vmem:[#allocation76_spill] sm:$0xff] }
 0x19f   : > { %v1028_v40 = vmax.f32 %v3601_v35, %v3600_v2  ;;  %v3608_v35 = vld [vmem:[#allocation67_spill] sm:$0xff] }
 0x1a2   : > { %1128 = vmax.xlane.f32.xlu0 %v1127_v55  ;;  %1035 = vmax.xlane.f32.xlu1 %v1034_v3  ;;  %v1124_v55 = vmax.f32 %v3603_v41, %v3602_v5 }
 0x1a6   : > { %1026 = vmax.xlane.f32.xlu0 %v1025_v52  ;;  %1131 = vmax.xlane.f32.xlu1 %v1130_v56  ;;  %v3606_v52 = vld [vmem:[#allocation62_spill] sm:$0xff] }
 0x1aa   : > { %1122 = vmax.xlane.f32.xlu0 %v1121_v58  ;;  %1029 = vmax.xlane.f32.xlu1 %v1028_v40 }
 0x1ae   : > { %1125 = vmax.xlane.f32.xlu1 %v1124_v55  ;;  %v3609_v55 = vld [vmem:[#allocation69_spill] sm:$0xff] }
 0x1b7   : > { %v1117_v3 = vpop.xlane.xlu1 %1116  ;;  %v1021_v45 = vpop.xlane.xlu0 %1020 }
 0x1b8   : > { %v1261_v49 = vsub.f32 %v3604_v48, %v1117_v3  ;;  %v1262_v57 = vsub.f32 %v3605_v42, %v1117_v3  ;;  %v1197_v56 = vsub.f32 %v3606_v52, %v1021_v45  ;;  %v1198_v44 = vsub.f32 %v3607_v43, %v1021_v45  ;;  %v3611_v48 = vld [vmem:[#allocation68_spill] sm:$0xff] }
 0x1ba   : > { %v1481_v4 = vmul.f32 1.442695, %v1261_v49  ;;  %v1483_v6 = vmul.f32 1.442695, %v1262_v57  ;;  %v1353_v33 = vmul.f32 1.442695, %v1197_v56 }
 0x1bb   : > { %v1355_v2 = vmul.f32 1.442695, %v1198_v44  ;;  %v1120_v58 = vpop.xlane.xlu1 %1119  ;;  %v1024_v40 = vpop.xlane.xlu0 %1023  ;;  %v3612_v57 = vld [vmem:[#allocation58_spill] sm:$0xff]  ;;  %v3613_v56 = vld [vmem:[#allocation60_spill] sm:$0xff] }
 0x1bc   : > { %2202 = vpow2.f32 %v1481_v4  ;;  %v1263_v5 = vsub.f32 %v3608_v35, %v1120_v58  ;;  %v1264_v41 = vsub.f32 %v3609_v55, %v1120_v58  ;;  %v1199_v46 = vsub.f32 %v3610_v37, %v1024_v40  ;;  %v3615_v37 = vld [vmem:[#allocation56_spill] sm:$0xff]  ;;  %v3616_v55 = vld [vmem:[#allocation59_spill] sm:$0xff] }
 0x1bd   : > { %2204 = vpow2.f32 %v1483_v6  ;;  %v1200_v42 = vsub.f32 %v3611_v48, %v1024_v40 }
 0x1be   : > { %2206 = vpow2.f32 %v1353_v33  ;;  %v1485_v3 = vmul.f32 1.442695, %v1263_v5  ;;  %v1487_v52 = vmul.f32 1.442695, %v1264_v41  ;;  %v1357_v43 = vmul.f32 1.442695, %v1199_v46 }
 0x1bf   : > { %2208 = vpow2.f32 %v1355_v2  ;;  %v1359_v45 = vmul.f32 1.442695, %v1200_v42  ;;  %v1018_v49 = vpop.xlane.xlu1 %1017  ;;  %v1015_v44 = vpop.xlane.xlu0 %1014  ;;  %v3617_v42 = vld [vmem:[#allocation61_spill] sm:$0xff] }
 0x1c0   : > { %2210 = vpow2.f32 %v1485_v3  ;;  %v1195_v4 = vsub.f32 %v3612_v57, %v1018_v49  ;;  %v1196_v35 = vsub.f32 %v3613_v56, %v1018_v49  ;;  %v1193_v58 = vsub.f32 %v3614_v34, %v1015_v44  ;;  %v3618_v57 = vld [vmem:[#allocation55_spill] sm:$0xff]  ;;  %v3619_v34 = vld [vmem:[#allocation57_spill] sm:$0xff] }
 0x1c1   : > { %2212 = vpow2.f32 %v1487_v52  ;;  %v1194_v6 = vsub.f32 %v3615_v37, %v1015_v44 }
 0x1c2   : > { %2214 = vpow2.f32 %v1357_v43  ;;  %v1349_v40 = vmul.f32 1.442695, %v1195_v4  ;;  %v1351_v33 = vmul.f32 1.442695, %v1196_v35  ;;  %v1345_v5 = vmul.f32 1.442695, %v1193_v58 }
 0x1c3   : > { %2216 = vpow2.f32 %v1359_v45  ;;  %v1347_v41 = vmul.f32 1.442695, %v1194_v6  ;;  %v1114_v46 = vpop.xlane.xlu1 %1113  ;;  %v1111_v2 = vpop.xlane.xlu0 %1110  ;;  %v3620_v58 = vld [vmem:[#allocation50_spill] sm:$0xff]  ;;  %v3621_v6 = vld [vmem:[#allocation52_spill] sm:$0xff] }
 0x1c4   : > { %2218 = vpow2.f32 %v1349_v40  ;;  %v1259_v48 = vsub.f32 %v3616_v55, %v1114_v46  ;;  %v1260_v3 = vsub.f32 %v3617_v42, %v1114_v46  ;;  %v1257_v49 = vsub.f32 %v3618_v57, %v1111_v2  ;;  %v3622_v55 = vld [vmem:[#allocation46_spill] sm:$0xff] }
 0x1c5   : > { %2220 = vpow2.f32 %v1351_v33  ;;  %v1258_v52 = vsub.f32 %v3619_v34, %v1111_v2  ;;  %v3623_v33 = vld [vmem:[#allocation48_spill] sm:$0xff] }
 0x1c6   : > { %2222 = vpow2.f32 %v1345_v5  ;;  %v1477_v44 = vmul.f32 1.442695, %v1259_v48  ;;  %v1479_v43 = vmul.f32 1.442695, %v1260_v3  ;;  %v1473_v4 = vmul.f32 1.442695, %v1257_v49 }
 0x1c7   : > { %2224 = vpow2.f32 %v1347_v41  ;;  %v1475_v56 = vmul.f32 1.442695, %v1258_v52  ;;  %v1012_v45 = vpop.xlane.xlu1 %1011  ;;  %v1009_v35 = vpop.xlane.xlu0 %1008 }
 0x1c8   : > { %2226 = vpow2.f32 %v1477_v44  ;;  %v1191_v37 = vsub.f32 %v3620_v58, %v1012_v45  ;;  %v1192_v40 = vsub.f32 %v3621_v6, %v1012_v45  ;;  %v1189_v46 = vsub.f32 %v3622_v55, %v1009_v35  ;;  %v3624_v58 = vld [vmem:[#allocation51_spill] sm:$0xff]  ;;  %v3625_v6 = vld [vmem:[#allocation53_spill] sm:$0xff] }
 0x1c9   : > { %v2203_v42 = vpop.eup %2202  ;;  %2228 = vpow2.f32 %v1479_v43  ;;  %v1190_v57 = vsub.f32 %v3623_v33, %v1009_v35  ;;  %v3627_v35 = vld [vmem:[#allocation49_spill] sm:$0xff] }
 0x1ca   : > { %v2205_v2 = vpop.eup %2204  ;;  %2230 = vpow2.f32 %v1473_v4  ;;  %v1341_v5 = vmul.f32 1.442695, %v1191_v37  ;;  %v1343_v48 = vmul.f32 1.442695, %v1192_v40  ;;  %v1337_v3 = vmul.f32 1.442695, %v1189_v46 }
 0x1cb   : > { %v2207_v41 = vpop.eup %2206  ;;  %2232 = vpow2.f32 %v1475_v56  ;;  %v1339_v49 = vmul.f32 1.442695, %v1190_v57  ;;  %v1108_v34 = vpop.xlane.xlu1 %1107 }
 0x1cc   : > { %v1105_v52 = vpop.xlane.xlu0 %1104  ;;  %v2209_v44 = vpop.eup %2208  ;;  %2234 = vpow2.f32 %v1341_v5  ;;  %v1255_v45 = vsub.f32 %v3624_v58, %v1108_v34  ;;  %v1256_v55 = vsub.f32 %v3625_v6, %v1108_v34  ;;  %v3628_v34 = vld [vmem:[#allocation42_spill] sm:$0xff]  ;;  %v3629_v6 = vld [vmem:[#allocation44_spill] sm:$0xff] }
 0x1cd   : > { %v1253_v43 = vsub.f32 %v3626_v39, %v1105_v52  ;;  %v2211_v27 = vpop.eup %2210  ;;  %2236 = vpow2.f32 %v1343_v48  ;;  %v1254_v4 = vsub.f32 %v3627_v35, %v1105_v52 }
 0x1ce   : > { %v2213_v37 = vpop.eup %2212  ;;  %2238 = vpow2.f32 %v1337_v3  ;;  %v1469_v40 = vmul.f32 1.442695, %v1255_v45  ;;  %v1471_v46 = vmul.f32 1.442695, %v1256_v55  ;;  %v1599_v58 = vpack.c.bf16 %v2211_v27, %v2203_v42  ;;  %v3631_v3 = vld [vmem:[#allocation40_spill] sm:$0xff] }
 0x1cf   : > { %v1465_v56 = vmul.f32 1.442695, %v1253_v43  ;;  %v2215_v33 = vpop.eup %2214  ;;  %2240 = vpow2.f32 %v1339_v49  ;;  %v1467_v57 = vmul.f32 1.442695, %v1254_v4  ;;  %v1006_v32 = vpop.xlane.xlu1 %1005  ;;  %v1600_v36 = vpack.c.bf16 %v2213_v37, %v2205_v2 }
 0x1d0   : > { %v1003_v5 = vpop.xlane.xlu0 %1002  ;;  %v2217_v25 = vpop.eup %2216  ;;  %2242 = vpow2.f32 %v1469_v40  ;;  %v1187_v39 = vsub.f32 %v3628_v34, %v1006_v32  ;;  %v1188_v48 = vsub.f32 %v3629_v6, %v1006_v32  ;;  %v1567_v49 = vpack.c.bf16 %v2215_v33, %v2207_v41  ;;  %v3634_v41 = vld [vmem:[#allocation39_spill] sm:$0xff]  ;;  %v3635_v33 = vld [vmem:[#allocation41_spill] sm:$0xff] }
 0x1d1   : > { %v1185_v52 = vsub.f32 %v3630_v29, %v1003_v5  ;;  %v3148_v35 = vpop.eup %2218  ;;  %2244 = vpow2.f32 %v1471_v46  ;;  %v1186_v45 = vsub.f32 %v3631_v3, %v1003_v5  ;;  %v1568_v55 = vpack.c.bf16 %v2217_v25, %v2209_v44  ;;  %1682 = vmatprep.subr.bf16.mxu1 %v1600_v36  ;;  %v3632_v46 = vld [vmem:[#allocation43_spill] sm:$0xff]  ;;  %v3633_v25 = vld [vmem:[#allocation45_spill] sm:$0xff] }
 0x1d2   : > { %v2221_v43 = vpop.eup %2220  ;;  %2246 = vpow2.f32 %v1465_v56  ;;  %v1333_v2 = vmul.f32 1.442695, %v1187_v39  ;;  %v1335_v27 = vmul.f32 1.442695, %v1188_v48  ;;  %1683 = vmatpush1.bf16.xpose.msra.mxu1 %v1599_v58 }
 0x1d3   : > { %v1329_v42 = vmul.f32 1.442695, %v1185_v52  ;;  %v2223_v4 = vpop.eup %2222  ;;  %2248 = vpow2.f32 %v1467_v57  ;;  %v1331_v37 = vmul.f32 1.442695, %v1186_v45  ;;  %1619 = vmatprep.subr.bf16.mxu0 %v1568_v55  ;;  %v1102_v32 = vpop.xlane.xlu1 %1101 }
 0x1d4   : > { %v1099_v29 = vpop.xlane.xlu0 %1098  ;;  %v2225_v40 = vpop.eup %2224  ;;  %2250 = vpow2.f32 %v1333_v2  ;;  %1620 = vmatpush1.bf16.xpose.msra.mxu0 %v1567_v49  ;;  %v1251_v5 = vsub.f32 %v3632_v46, %v1102_v32  ;;  %v1252_v36 = vsub.f32 %v3633_v25, %v1102_v32  ;;  %v1565_v49 = vpack.c.bf16 %v3148_v35, %v2223_v4  ;;  %v3636_v32 = vld [vmem:[#allocation34_spill] sm:$0xff]  ;;  %v3637_v46 = vld [vmem:[#allocation36_spill] sm:$0xff] }
 0x1d5   : > { %v1249_v44 = vsub.f32 %v3634_v41, %v1099_v29  ;;  %v2227_v56 = vpop.eup %2226  ;;  %2252 = vpow2.f32 %v1335_v27  ;;  %v1250_v34 = vsub.f32 %v3635_v33, %v1099_v29  ;;  %v1566_v58 = vpack.c.bf16 %v2221_v43, %v2225_v40  ;;  %v3638_v43 = vld [vmem:[#allocation30_spill] sm:$0xff] }
 0x1d6   : > { %v2229_v39 = vpop.eup %2228  ;;  %2254 = vpow2.f32 %v1329_v42  ;;  %v1461_v57 = vmul.f32 1.442695, %v1251_v5  ;;  %v1463_v6 = vmul.f32 1.442695, %v1252_v36  ;;  %v3639_v5 = vld [vmem:[#allocation32_spill] sm:$0xff] }
 0x1d7   : > { %v1457_v48 = vmul.f32 1.442695, %v1249_v44  ;;  %v2231_v52 = vpop.eup %2230  ;;  %2256 = vpow2.f32 %v1331_v37  ;;  %v1459_v3 = vmul.f32 1.442695, %v1250_v34  ;;  %1621 = vmatprep.subr.bf16.mxu0 %v1566_v58  ;;  %v1000_v45 = vpop.xlane.xlu1 %999 }
 0x1d8   : > { %v997_v55 = vpop.xlane.xlu0 %996  ;;  %v2233_v2 = vpop.eup %2232  ;;  %2258 = vpow2.f32 %v1461_v57  ;;  %v1183_v27 = vsub.f32 %v3636_v32, %v1000_v45  ;;  %v1184_v29 = vsub.f32 %v3637_v46, %v1000_v45  ;;  %v1597_v37 = vpack.c.bf16 %v2227_v56, %v2231_v52  ;;  %v3642_v56 = vld [vmem:[#allocation31_spill] sm:$0xff] }
 0x1d9   : > { %v1181_v40 = vsub.f32 %v3638_v43, %v997_v55  ;;  %v2235_v42 = vpop.eup %2234  ;;  %2260 = vpow2.f32 %v1463_v6  ;;  %v1182_v25 = vsub.f32 %v3639_v5, %v997_v55  ;;  %v1598_v36 = vpack.c.bf16 %v2229_v39, %v2233_v2  ;;  %v3640_v6 = vld [vmem:[#allocation35_spill] sm:$0xff]  ;;  %v3641_v55 = vld [vmem:[#allocation37_spill] sm:$0xff] }
 0x1da   : > { %v2237_v41 = vpop.eup %2236  ;;  %2262 = vpow2.f32 %v1457_v48  ;;  %v1325_v44 = vmul.f32 1.442695, %v1183_v27  ;;  %v1327_v33 = vmul.f32 1.442695, %v1184_v29  ;;  %v3643_v2 = vld [vmem:[#allocation33_spill] sm:$0xff] }
 0x1db   : > { %v1321_v34 = vmul.f32 1.442695, %v1181_v40  ;;  %v2239_v35 = vpop.eup %2238  ;;  %2264 = vpow2.f32 %v1459_v3  ;;  %v1323_v4 = vmul.f32 1.442695, %v1182_v25  ;;  %1684 = vmatprep.subr.bf16.mxu1 %v1598_v36  ;;  %v1096_v58 = vpop.xlane.xlu1 %1095 }
 0x1dc   : > { %v1093_v57 = vpop.xlane.xlu0 %1092  ;;  %v2241_v45 = vpop.eup %2240  ;;  %2266 = vpow2.f32 %v1325_v44  ;;  %1622 = vmatpush1.bf16.xpose.msra.mxu0 %v1565_v49  ;;  %1685 = vmatpush1.bf16.xpose.msra.mxu1 %v1597_v37  ;;  %v1247_v32 = vsub.f32 %v3640_v6, %v1096_v58  ;;  %v1248_v39 = vsub.f32 %v3641_v55, %v1096_v58  ;;  %v1563_v37 = vpack.c.bf16 %v2235_v42, %v2239_v35  ;;  %v3644_v58 = vld [vmem:[#allocation26_spill] sm:$0xff] }
 0x1dd   : > { %v1245_v52 = vsub.f32 %v3642_v56, %v1093_v57  ;;  %v2243_v48 = vpop.eup %2242  ;;  %2268 = vpow2.f32 %v1327_v33  ;;  %v1246_v27 = vsub.f32 %v3643_v2, %v1093_v57  ;;  %v1564_v46 = vpack.c.bf16 %v2237_v41, %v2241_v45  ;;  %v3645_v33 = vld [vmem:[#allocation28_spill] sm:$0xff]  ;;  %v3646_v57 = vld [vmem:[#allocation22_spill] sm:$0xff] }
 0x1de   : > { %v2245_v3 = vpop.eup %2244  ;;  %2270 = vpow2.f32 %v1321_v34  ;;  %v1453_v29 = vmul.f32 1.442695, %v1247_v32  ;;  %v1455_v43 = vmul.f32 1.442695, %v1248_v39  ;;  %v3647_v34 = vld [vmem:[#allocation24_spill] sm:$0xff] }
 0x1df   : > { %v1449_v40 = vmul.f32 1.442695, %v1245_v52  ;;  %v2247_v5 = vpop.eup %2246  ;;  %2272 = vpow2.f32 %v1323_v4  ;;  %v1451_v49 = vmul.f32 1.442695, %v1246_v27  ;;  %1623 = vmatprep.subr.bf16.mxu0 %v1564_v46  ;;  %v994_v25 = vpop.xlane.xlu1 %993 }
 0x1e0   : > { %v991_v36 = vpop.xlane.xlu0 %990  ;;  %v2249_v44 = vpop.eup %2248  ;;  %2274 = vpow2.f32 %v1453_v29  ;;  %v1179_v6 = vsub.f32 %v3644_v58, %v994_v25  ;;  %v1180_v55 = vsub.f32 %v3645_v33, %v994_v25  ;;  %v1595_v56 = vpack.c.bf16 %v2243_v48, %v2247_v5  ;;  %v3650_v48 = vld [vmem:[#allocation23_spill] sm:$0xff] }
 0x1e1   : > { %v1177_v41 = vsub.f32 %v3646_v57, %v991_v36  ;;  %v2251_v45 = vpop.eup %2250  ;;  %2276 = vpow2.f32 %v1455_v43  ;;  %v1178_v32 = vsub.f32 %v3647_v34, %v991_v36  ;;  %v1596_v39 = vpack.c.bf16 %v2245_v3, %v2249_v44  ;;  %v3648_v43 = vld [vmem:[#allocation27_spill] sm:$0xff]  ;;  %v3649_v36 = vld [vmem:[#allocation29_spill] sm:$0xff] }
 0x1e2   : > { %v2253_v4 = vpop.eup %2252  ;;  %2278 = vpow2.f32 %v1449_v40  ;;  %v1317_v52 = vmul.f32 1.442695, %v1179_v6  ;;  %v1319_v2 = vmul.f32 1.442695, %v1180_v55  ;;  %v3651_v44 = vld [vmem:[#allocation25_spill] sm:$0xff] }
 0x1e3   : > { %v1313_v27 = vmul.f32 1.442695, %v1177_v41  ;;  %v2255_v42 = vpop.eup %2254  ;;  %2280 = vpow2.f32 %v1451_v49  ;;  %v1315_v35 = vmul.f32 1.442695, %v1178_v32  ;;  %1686 = vmatprep.subr.bf16.mxu1 %v1596_v39  ;;  %v1090_v46 = vpop.xlane.xlu1 %1089 }
 0x1e4   : > { %v1087_v29 = vpop.xlane.xlu0 %1086  ;;  %v2257_v25 = vpop.eup %2256  ;;  %2282 = vpow2.f32 %v1317_v52  ;;  %1624 = vmatpush1.bf16.xpose.msra.mxu0 %v1563_v37  ;;  %1687 = vmatpush1.bf16.xpose.msra.mxu1 %v1595_v56  ;;  %v1243_v58 = vsub.f32 %v3648_v43, %v1090_v46  ;;  %v1244_v3 = vsub.f32 %v3649_v36, %v1090_v46  ;;  %v1561_v56 = vpack.c.bf16 %v2251_v45, %v2255_v42  ;;  %v3652_v46 = vld [vmem:[#allocation18_spill] sm:$0xff] }
 0x1e5   : > { %v1241_v5 = vsub.f32 %v3650_v48, %v1087_v29  ;;  %v2259_v40 = vpop.eup %2258  ;;  %2284 = vpow2.f32 %v1319_v2  ;;  %v1242_v6 = vsub.f32 %v3651_v44, %v1087_v29  ;;  %v1562_v33 = vpack.c.bf16 %v2253_v4, %v2257_v25  ;;  %v3653_v2 = vld [vmem:[#allocation20_spill] sm:$0xff]  ;;  %v3654_v29 = vld [vmem:[#allocation14_spill] sm:$0xff] }
 0x1e6   : > { %v2261_v49 = vpop.eup %2260  ;;  %2286 = vpow2.f32 %v1313_v27  ;;  %v1445_v55 = vmul.f32 1.442695, %v1243_v58  ;;  %v1447_v57 = vmul.f32 1.442695, %v1244_v3  ;;  %v3655_v27 = vld [vmem:[#allocation16_spill] sm:$0xff] }
 0x1e7   : > { %v1441_v41 = vmul.f32 1.442695, %v1241_v5  ;;  %v2263_v34 = vpop.eup %2262  ;;  %2288 = vpow2.f32 %v1315_v35  ;;  %v1443_v37 = vmul.f32 1.442695, %v1242_v6  ;;  %1625 = vmatprep.subr.bf16.mxu0 %v1562_v33  ;;  %v988_v32 = vpop.xlane.xlu1 %987 }
 0x1e8   : > { %v985_v39 = vpop.xlane.xlu0 %984  ;;  %v2265_v52 = vpop.eup %2264  ;;  %2290 = vpow2.f32 %v1445_v55  ;;  %v1175_v43 = vsub.f32 %v3652_v46, %v988_v32  ;;  %v1176_v36 = vsub.f32 %v3653_v2, %v988_v32  ;;  %v1593_v48 = vpack.c.bf16 %v2259_v40, %v2263_v34  ;;  %v3658_v40 = vld [vmem:[#allocation15_spill] sm:$0xff] }
 0x1e9   : > { %v1173_v4 = vsub.f32 %v3654_v29, %v985_v39  ;;  %v2267_v25 = vpop.eup %2266  ;;  %2292 = vpow2.f32 %v1447_v57  ;;  %v1174_v58 = vsub.f32 %v3655_v27, %v985_v39  ;;  %v1594_v3 = vpack.c.bf16 %v2261_v49, %v2265_v52  ;;  %v3656_v57 = vld [vmem:[#allocation19_spill] sm:$0xff]  ;;  %v3657_v39 = vld [vmem:[#allocation21_spill] sm:$0xff] }
 0x1ea   : > { %v2269_v35 = vpop.eup %2268  ;;  %2294 = vpow2.f32 %v1441_v41  ;;  %v1309_v5 = vmul.f32 1.442695, %v1175_v43  ;;  %v1311_v44 = vmul.f32 1.442695, %v1176_v36  ;;  %v3659_v52 = vld [vmem:[#allocation17_spill] sm:$0xff] }
 0x1eb   : > { %v1305_v6 = vmul.f32 1.442695, %v1173_v4  ;;  %v2271_v45 = vpop.eup %2270  ;;  %2296 = vpow2.f32 %v1443_v37  ;;  %v1307_v42 = vmul.f32 1.442695, %v1174_v58  ;;  %1688 = vmatprep.subr.bf16.mxu1 %v1594_v3  ;;  %v1084_v33 = vpop.xlane.xlu1 %1083 }
 0x1ec   : > { %v1081_v55 = vpop.xlane.xlu0 %1080  ;;  %v2273_v32 = vpop.eup %2272  ;;  %2298 = vpow2.f32 %v1309_v5  ;;  %1626 = vmatpush1.bf16.xpose.msra.mxu0 %v1561_v56  ;;  %1689 = vmatpush1.bf16.xpose.msra.mxu1 %v1593_v48  ;;  %v1239_v46 = vsub.f32 %v3656_v57, %v1084_v33  ;;  %v1240_v49 = vsub.f32 %v3657_v39, %v1084_v33  ;;  %v1559_v48 = vpack.c.bf16 %v2267_v25, %v2271_v45  ;;  %v3660_v33 = vld [vmem:[#allocation10_spill] sm:$0xff] }
 0x1ed   : > { %v1237_v34 = vsub.f32 %v3658_v40, %v1081_v55  ;;  %v2275_v41 = vpop.eup %2274  ;;  %2300 = vpow2.f32 %v1311_v44  ;;  %v1238_v43 = vsub.f32 %v3659_v52, %v1081_v55  ;;  %v1560_v2 = vpack.c.bf16 %v2269_v35, %v2273_v32  ;;  %v3661_v44 = vld [vmem:[#allocation12_spill] sm:$0xff]  ;;  %v3662_v55 = vld [vmem:[#allocation6_spill] sm:$0xff] }
 0x1ee   : > { %v2277_v37 = vpop.eup %2276  ;;  %2302 = vpow2.f32 %v1305_v6  ;;  %v1437_v36 = vmul.f32 1.442695, %v1239_v46  ;;  %v1439_v29 = vmul.f32 1.442695, %v1240_v49  ;;  %v3663_v6 = vld [vmem:[#allocation8_spill] sm:$0xff] }
 0x1ef   : > { %v1433_v4 = vmul.f32 1.442695, %v1237_v34  ;;  %v2279_v27 = vpop.eup %2278  ;;  %2304 = vpow2.f32 %v1307_v42  ;;  %v1435_v56 = vmul.f32 1.442695, %v1238_v43  ;;  %1627 = vmatprep.subr.bf16.mxu0 %v1560_v2  ;;  %v982_v58 = vpop.xlane.xlu1 %981 }
 0x1f0   : > { %v979_v3 = vpop.xlane.xlu0 %978  ;;  %v2281_v5 = vpop.eup %2280  ;;  %2306 = vpow2.f32 %v1437_v36  ;;  %v1171_v57 = vsub.f32 %v3660_v33, %v982_v58  ;;  %v1172_v39 = vsub.f32 %v3661_v44, %v982_v58  ;;  %v1591_v40 = vpack.c.bf16 %v2275_v41, %v2279_v27  ;;  %v3665_v27 = vld [vmem:[#allocation9_spill] sm:$0xff] }
 0x1f1   : > { %v1169_v35 = vsub.f32 %v3662_v55, %v979_v3  ;;  %v2283_v32 = vpop.eup %2282  ;;  %2308 = vpow2.f32 %v1439_v29  ;;  %v1170_v46 = vsub.f32 %v3663_v6, %v979_v3  ;;  %v1592_v49 = vpack.c.bf16 %v2277_v37, %v2281_v5  ;;  %v3664_v3 = vld [vmem:[#allocation13_spill] sm:$0xff]  ;;  %v3666_v6 = vld [vmem:[#allocation11_spill] sm:$0xff] }
 0x1f2   : > { %v2285_v42 = vpop.eup %2284  ;;  %2310 = vpow2.f32 %v1433_v4  ;;  %v1301_v34 = vmul.f32 1.442695, %v1171_v57  ;;  %v1303_v52 = vmul.f32 1.442695, %v1172_v39 }
 0x1f3   : > { %v1297_v43 = vmul.f32 1.442695, %v1169_v35  ;;  %v2287_v25 = vpop.eup %2286  ;;  %2312 = vpow2.f32 %v1435_v56  ;;  %v1299_v45 = vmul.f32 1.442695, %v1170_v46  ;;  %1690 = vmatprep.subr.bf16.mxu1 %v1592_v49  ;;  %v1078_v2 = vpop.xlane.xlu1 %1077 }
 0x1f4   : > { %v1075_v36 = vpop.xlane.xlu0 %1074  ;;  %v2289_v58 = vpop.eup %2288  ;;  %2314 = vpow2.f32 %v1301_v34  ;;  %1628 = vmatpush1.bf16.xpose.msra.mxu0 %v1559_v48  ;;  %1691 = vmatpush1.bf16.xpose.msra.mxu1 %v1591_v40  ;;  %v1235_v29 = vsub.f32 %v3593_v59, %v1078_v2  ;;  %v1236_v37 = vsub.f32 %v3664_v3, %v1078_v2  ;;  %v1557_v2 = vpack.c.bf16 %v2283_v32, %v2287_v25 }
 0x1f5   : > { %v1233_v41 = vsub.f32 %v3595_v53, %v1075_v36  ;;  %v2291_v4 = vpop.eup %2290  ;;  %2316 = vpow2.f32 %v1303_v52  ;;  %v1234_v5 = vsub.f32 %v3665_v27, %v1075_v36  ;;  %v1558_v33 = vpack.c.bf16 %v2285_v42, %v2289_v58  ;;  %v3667_v53 = vld [vmem:[#allocation7_spill] sm:$0xff] }
 0x1f6   : > { %v2293_v56 = vpop.eup %2292  ;;  %2318 = vpow2.f32 %v1297_v43  ;;  %v1429_v57 = vmul.f32 1.442695, %v1235_v29  ;;  %v1431_v44 = vmul.f32 1.442695, %v1236_v37 }
 0x1f7   : > { %v1425_v39 = vmul.f32 1.442695, %v1233_v41  ;;  %v2295_v55 = vpop.eup %2294  ;;  %2320 = vpow2.f32 %v1299_v45  ;;  %v1427_v48 = vmul.f32 1.442695, %v1234_v5  ;;  %1629 = vmatprep.subr.bf16.mxu0 %v1558_v33  ;;  %v3668_v41 = vld [vmem:[#allocation98_spill] sm:$0xff] }
 0x1f8   : > { %v1069_v35 = vpop.xlane.xlu0 %1068  ;;  %v2297_v59 = vpop.eup %2296  ;;  %2322 = vpow2.f32 %v1429_v57  ;;  %v1589_v40 = vpack.c.bf16 %v2291_v4, %v2295_v55 }
 0x1f9   : > { %v1229_v46 = vsub.f32 %v3666_v6, %v1069_v35  ;;  %v1230_v49 = vsub.f32 %v3667_v53, %v1069_v35  ;;  %v2299_v34 = vpop.eup %2298  ;;  %2324 = vpow2.f32 %v1431_v44  ;;  %v1590_v42 = vpack.c.bf16 %v2293_v56, %v2297_v59 }
 0x1fa   : > { %v2301_v52 = vpop.eup %2300  ;;  %2326 = vpow2.f32 %v1425_v39 }
 0x1fb   : > { %v1417_v43 = vmul.f32 1.442695, %v1229_v46  ;;  %v2303_v36 = vpop.eup %2302  ;;  %2328 = vpow2.f32 %v1427_v48  ;;  %v1419_v45 = vmul.f32 1.442695, %v1230_v49  ;;  %1692 = vmatprep.subr.bf16.mxu1 %v1590_v42  ;;  %v1072_v29 = vpop.xlane.xlu1 %1071 }
 0x1fc   : > { %v1165_v58 = vpop.xlane.xlu0 %1164  ;;  %v2305_v3 = vpop.eup %2304  ;;  %1630 = vmatpush1.bf16.xpose.msra.mxu0 %v1557_v2  ;;  %1693 = vmatpush1.bf16.xpose.msra.mxu1 %v1589_v40  ;;  %v1231_v27 = vsub.f32 %v3051_v50, %v1072_v29  ;;  %v1232_v33 = vsub.f32 %v3055_v7, %v1072_v29 }
 0x1fd   : > { %v1293_v37 = vsub.f32 %v3043_v54, %v1165_v58  ;;  %v1294_v4 = vsub.f32 %v3668_v41, %v1165_v58  ;;  %v2307_v5 = vpop.eup %2306  ;;  %v1556_v56 = vpack.c.bf16 %v2301_v52, %v2305_v3  ;;  %2330 = vpow2.f32 %v1417_v43 }
 0x1fe   : > { %v2309_v32 = vpop.eup %2308  ;;  %v1421_v44 = vmul.f32 1.442695, %v1231_v27  ;;  %2332 = vpow2.f32 %v1419_v45  ;;  %v1423_v55 = vmul.f32 1.442695, %v1232_v33  ;;  %v1555_v54 = vpack.c.bf16 %v2299_v34, %v2303_v36 }
 0x1ff   : > { %v1545_v25 = vmul.f32 1.442695, %v1293_v37  ;;  %v1547_v57 = vmul.f32 1.442695, %v1294_v4  ;;  %v2311_v39 = vpop.eup %2310  ;;  %1631 = vmatprep.subr.bf16.mxu0 %v1556_v56  ;;  %v1168_v35 = vpop.xlane.xlu1 %1167 }
 0x200   : > { %v1063_v48 = vpop.xlane.xlu0 %1062  ;;  %v2313_v59 = vpop.eup %2312  ;;  %v1295_v7 = vsub.f32 %v3053_v47, %v1168_v35  ;;  %v1296_v53 = vsub.f32 %v3061_v51, %v1168_v35  ;;  %v1587_v40 = vpack.c.bf16 %v2307_v5, %v2311_v39 }
 0x201   : > { %2334 = vpow2.f32 %v1545_v25  ;;  %v1225_v50 = vsub.f32 %v3017_v0, %v1063_v48  ;;  %v1226_v6 = vsub.f32 %v3021_v60, %v1063_v48  ;;  %v2315_v46 = vpop.eup %2314  ;;  %v1588_v49 = vpack.c.bf16 %v2309_v32, %v2313_v59 }
 0x202   : > { %2336 = vpow2.f32 %v1547_v57  ;;  %v2317_v42 = vpop.eup %2316  ;;  %v1549_v2 = vmul.f32 1.442695, %v1295_v7  ;;  %v1551_v36 = vmul.f32 1.442695, %v1296_v53 }
 0x203   : > { %2338 = vpow2.f32 %v1421_v44  ;;  %v1409_v52 = vmul.f32 1.442695, %v1225_v50  ;;  %v1411_v43 = vmul.f32 1.442695, %v1226_v6  ;;  %v2319_v34 = vpop.eup %2318  ;;  %1694 = vmatprep.subr.bf16.mxu1 %v1588_v49  ;;  %v1066_v45 = vpop.xlane.xlu1 %1065 }
 0x204   : > { %2340 = vpow2.f32 %v1423_v55  ;;  %v1159_v0 = vpop.xlane.xlu0 %1158  ;;  %v2321_v60 = vpop.eup %2320  ;;  %1632 = vmatpush1.bf16.xpose.msra.mxu0 %v1555_v54  ;;  %1695 = vmatpush1.bf16.xpose.msra.mxu1 %v1587_v40  ;;  %v1227_v58 = vsub.f32 %v3029_v1, %v1066_v45  ;;  %v1228_v3 = vsub.f32 %v3033_v61, %v1066_v45  ;;  %v1553_v25 = vpack.c.bf16 %v2315_v46, %v2319_v34 }
 0x205   : > { %2342 = vpow2.f32 %v1409_v52  ;;  %v1289_v47 = vsub.f32 %v3019_v62, %v1159_v0  ;;  %v1290_v51 = vsub.f32 %v3023_v14, %v1159_v0  ;;  %v2323_v29 = vpop.eup %2322  ;;  %v1554_v37 = vpack.c.bf16 %v2317_v42, %v2321_v60 }
 0x206   : > { %2344 = vpow2.f32 %v1411_v43  ;;  %v2325_v41 = vpop.eup %2324  ;;  %v1413_v5 = vmul.f32 1.442695, %v1227_v58  ;;  %v1415_v56 = vmul.f32 1.442695, %v1228_v3 }
 0x207   : > { %2346 = vpow2.f32 %v1549_v2  ;;  %v1537_v4 = vmul.f32 1.442695, %v1289_v47  ;;  %v1539_v27 = vmul.f32 1.442695, %v1290_v51  ;;  %v2327_v33 = vpop.eup %2326  ;;  %1633 = vmatprep.subr.bf16.mxu0 %v1554_v37  ;;  %v1162_v62 = vpop.xlane.xlu1 %1161 }
 0x208   : > { %2348 = vpow2.f32 %v1551_v36  ;;  %v1057_v32 = vpop.xlane.xlu0 %1056  ;;  %v2329_v14 = vpop.eup %2328  ;;  %v1291_v61 = vsub.f32 %v3031_v63, %v1162_v62  ;;  %v1292_v44 = vsub.f32 %v3035_v15, %v1162_v62  ;;  %v1585_v55 = vpack.c.bf16 %v2323_v29, %v2327_v33 }
 0x209   : > { %2350 = vpow2.f32 %v1537_v4  ;;  %v1221_v1 = vsub.f32 %v2993_v12, %v1057_v32  ;;  %v1222_v57 = vsub.f32 %v2997_v8, %v1057_v32  ;;  %v1586_v39 = vpack.c.bf16 %v2325_v41, %v2329_v14 }
 0x20a   : > { %2352 = vpow2.f32 %v1539_v27  ;;  %v1541_v54 = vmul.f32 1.442695, %v1291_v61  ;;  %v2331_v59 = vpop.eup %2330  ;;  %v1543_v50 = vmul.f32 1.442695, %v1292_v44 }
 0x20b   : > { %2354 = vpow2.f32 %v1413_v5  ;;  %v1401_v48 = vmul.f32 1.442695, %v1221_v1  ;;  %v1403_v35 = vmul.f32 1.442695, %v1222_v57  ;;  %1696 = vmatprep.subr.bf16.mxu1 %v1586_v39  ;;  %v1060_v7 = vpop.xlane.xlu1 %1059  ;;  %v2333_v12 = vpop.eup %2332 }
 0x20c   : > { %2356 = vpow2.f32 %v1415_v56  ;;  %v1153_v6 = vpop.xlane.xlu0 %1152  ;;  %1634 = vmatpush1.bf16.xpose.msra.mxu0 %v1553_v25  ;;  %1697 = vmatpush1.bf16.xpose.msra.mxu1 %v1585_v55  ;;  %v1223_v15 = vsub.f32 %v3005_v13, %v1060_v7  ;;  %v1224_v53 = vsub.f32 %v3009_v9, %v1060_v7 }
 0x20d   : > { %2358 = vpow2.f32 %v1401_v48  ;;  %v1285_v63 = vsub.f32 %v2995_v10, %v1153_v6  ;;  %v1286_v8 = vsub.f32 %v2999_v22, %v1153_v6 }
 0x20e   : > { %v2335_v46 = vpop.eup %2334  ;;  %2360 = vpow2.f32 %v1403_v35  ;;  %v1405_v52 = vmul.f32 1.442695, %v1223_v15  ;;  %v1407_v2 = vmul.f32 1.442695, %v1224_v53  ;;  %v3669_v15 = vld [vmem:[#allocation94_spill] sm:$0xff] }
 0x20f   : > { %v2337_v49 = vpop.eup %2336  ;;  %2362 = vpow2.f32 %v1541_v54  ;;  %v1529_v40 = vmul.f32 1.442695, %v1285_v63  ;;  %v1531_v42 = vmul.f32 1.442695, %v1286_v8  ;;  %v1156_v36 = vpop.xlane.xlu1 %1155 }
 0x210   : > { %v2339_v43 = vpop.eup %2338  ;;  %2364 = vpow2.f32 %v1543_v50  ;;  %v1051_v34 = vpop.xlane.xlu0 %1050  ;;  %v1287_v22 = vsub.f32 %v3007_v11, %v1156_v36  ;;  %v1288_v9 = vsub.f32 %v3011_v23, %v1156_v36 }
 0x211   : > { %v2341_v0 = vpop.eup %2340  ;;  %2366 = vpow2.f32 %v1529_v40  ;;  %v1217_v10 = vsub.f32 %v2969_v20, %v1051_v34  ;;  %v1218_v13 = vsub.f32 %v2973_v16, %v1051_v34  ;;  %v1583_v47 = vpack.c.bf16 %v2339_v43, %v2331_v59 }
 0x212   : > { %v2343_v45 = vpop.eup %2342  ;;  %2368 = vpow2.f32 %v1531_v42  ;;  %v1584_v60 = vpack.c.bf16 %v2341_v0, %v2333_v12  ;;  %v1533_v3 = vmul.f32 1.442695, %v1287_v22  ;;  %v1535_v41 = vmul.f32 1.442695, %v1288_v9  ;;  %v3671_v22 = vld [vmem:[#allocation86_spill] sm:$0xff]  ;;  %v3672_v9 = vld [vmem:[#allocation88_spill] sm:$0xff] }
 0x213   : > { %v2345_v51 = vpop.eup %2344  ;;  %2370 = vpow2.f32 %v1405_v52  ;;  %v1393_v58 = vmul.f32 1.442695, %v1217_v10  ;;  %v1395_v29 = vmul.f32 1.442695, %v1218_v13  ;;  %v1054_v4 = vpop.xlane.xlu1 %1053 }
 0x214   : > { %v2347_v37 = vpop.eup %2346  ;;  %2372 = vpow2.f32 %v1407_v2  ;;  %1635 = vmatprep.subr.bf16.mxu0 %v1584_v60  ;;  %v1147_v20 = vpop.xlane.xlu0 %1146  ;;  %v1219_v27 = vsub.f32 %v2981_v21, %v1054_v4  ;;  %v1220_v33 = vsub.f32 %v2985_v17, %v1054_v4 }
 0x215   : > { %v2349_v16 = vpop.eup %2348  ;;  %2374 = vpow2.f32 %v1393_v58  ;;  %1636 = vmatpush2.bf16.xpose.msra.mxu0 %v1583_v47  ;;  %v1281_v11 = vsub.f32 %v2971_v18, %v1147_v20  ;;  %v1282_v23 = vsub.f32 %v2975_v30, %v1147_v20  ;;  %v1615_v32 = vpack.c.bf16 %v2347_v37, %v2335_v46  ;;  %v3673_v47 = vld [vmem:[#allocation95_spill] sm:$0xff] }
 0x216   : > { %v2351_v5 = vpop.eup %2350  ;;  %2376 = vpow2.f32 %v1395_v29  ;;  %v1616_v56 = vpack.c.bf16 %v2349_v16, %v2337_v49  ;;  %v1397_v1 = vmul.f32 1.442695, %v1219_v27  ;;  %v1399_v61 = vmul.f32 1.442695, %v1220_v33  ;;  %v3670_v49 = vld [vmem:[#allocation96_spill] sm:$0xff]  ;;  %v3674_v29 = vld [vmem:[#allocation97_spill] sm:$0xff] }
 0x217   : > { %v2353_v62 = vpop.eup %2352  ;;  %2378 = vpow2.f32 %v1533_v3  ;;  %v1521_v25 = vmul.f32 1.442695, %v1281_v11  ;;  %v1523_v14 = vmul.f32 1.442695, %v1282_v23  ;;  %v1150_v44 = vpop.xlane.xlu1 %1149 }
 0x218   : > { %v2355_v57 = vpop.eup %2354  ;;  %2380 = vpow2.f32 %v1535_v41  ;;  %1698 = vmatprep.subr.bf16.mxu1 %v1616_v56  ;;  %v1045_v18 = vpop.xlane.xlu0 %1044  ;;  %v1283_v39 = vsub.f32 %v2983_v19, %v1150_v44  ;;  %v1284_v48 = vsub.f32 %v2987_v31, %v1150_v44 }
 0x219   : > { %v2357_v30 = vpop.eup %2356  ;;  %2382 = vpow2.f32 %v1521_v25  ;;  %1699 = vmatpush2.bf16.xpose.msra.mxu1 %v1615_v32  ;;  %v1213_v21 = vsub.f32 %v2945_v28, %v1045_v18  ;;  %v1214_v17 = vsub.f32 %v2949_v24, %v1045_v18  ;;  %v1581_v54 = vpack.c.bf16 %v2355_v57, %v2343_v45  ;;  %v3675_v32 = vld [vmem:[#allocation87_spill] sm:$0xff]  ;;  %v3676_v25 = vld [vmem:[#allocation89_spill] sm:$0xff]  ;;  %v3678_v18 = vld [vmem:[#allocation92_spill] sm:$0xff] }
 0x21a   : > { %v2359_v55 = vpop.eup %2358  ;;  %2384 = vpow2.f32 %v1523_v14  ;;  %v1582_v35 = vpack.c.bf16 %v2357_v30, %v2345_v51  ;;  %v1525_v7 = vmul.f32 1.442695, %v1283_v39  ;;  %v1527_v63 = vmul.f32 1.442695, %v1284_v48 }
 0x21b   : > { %v2361_v59 = vpop.eup %2360  ;;  %2386 = vpow2.f32 %v1397_v1  ;;  %v1385_v50 = vmul.f32 1.442695, %v1213_v21  ;;  %v1387_v6 = vmul.f32 1.442695, %v1214_v17  ;;  %v1048_v8 = vpop.xlane.xlu1 %1047  ;;  %v3677_v1 = vld [vmem:[#allocation90_spill] sm:$0xff] }
 0x21c   : > { %v2363_v12 = vpop.eup %2362  ;;  %2388 = vpow2.f32 %v1399_v61  ;;  %1637 = vmatprep.subr.bf16.mxu0 %v1582_v35  ;;  %v1141_v28 = vpop.xlane.xlu0 %1140  ;;  %v1215_v46 = vsub.f32 %v3669_v15, %v1048_v8  ;;  %v1216_v40 = vsub.f32 %v3670_v49, %v1048_v8  ;;  %v3681_v8 = vld [vmem:[#allocation91_spill] sm:$0xff] }
 0x21d   : > { %v2365_v24 = vpop.eup %2364  ;;  %2390 = vpow2.f32 %v1385_v50  ;;  %1638 = vmatpush2.bf16.xpose.msra.mxu0 %v1581_v54  ;;  %v1277_v19 = vsub.f32 %v2947_v26, %v1141_v28  ;;  %v1278_v31 = vsub.f32 %v2951_v38, %v1141_v28  ;;  %v1613_v52 = vpack.c.bf16 %v2363_v12, %v2351_v5 }
 0x21e   : > { %v2367_v53 = vpop.eup %2366  ;;  %2392 = vpow2.f32 %v1387_v6  ;;  %v1614_v42 = vpack.c.bf16 %v2365_v24, %v2353_v62  ;;  %v1389_v36 = vmul.f32 1.442695, %v1215_v46  ;;  %v1391_v10 = vmul.f32 1.442695, %v1216_v40 }
 0x21f   : > { %v2369_v43 = vpop.eup %2368  ;;  %2394 = vpow2.f32 %v1525_v7  ;;  %v1513_v2 = vmul.f32 1.442695, %v1277_v19  ;;  %v1515_v34 = vmul.f32 1.442695, %v1278_v31  ;;  %v1144_v13 = vpop.xlane.xlu1 %1143  ;;  %v3679_v7 = vld [vmem:[#allocation78_spill] sm:$0xff]  ;;  %v3682_v31 = vld [vmem:[#allocation93_spill] sm:$0xff] }
 0x220   : > { %v2371_v0 = vpop.eup %2370  ;;  %2396 = vpow2.f32 %v1527_v63  ;;  %1700 = vmatprep.subr.bf16.mxu1 %v1614_v42  ;;  %v1039_v26 = vpop.xlane.xlu0 %1038  ;;  %v1279_v51 = vsub.f32 %v3673_v47, %v1144_v13  ;;  %v1280_v3 = vsub.f32 %v3674_v29, %v1144_v13  ;;  %v3680_v63 = vld [vmem:[#allocation80_spill] sm:$0xff]  ;;  %v3684_v13 = vld [vmem:[#allocation81_spill] sm:$0xff] }
 0x221   : > { %v2373_v38 = vpop.eup %2372  ;;  %2398 = vpow2.f32 %v1513_v2  ;;  %1701 = vmatpush2.bf16.xpose.msra.mxu1 %v1613_v52  ;;  %v1209_v45 = vsub.f32 %v3671_v22, %v1039_v26  ;;  %v1210_v60 = vsub.f32 %v3672_v9, %v1039_v26  ;;  %v1579_v41 = vpack.c.bf16 %v2371_v0, %v2359_v55  ;;  %v3685_v22 = vld [vmem:[#allocation82_spill] sm:$0xff] }
 0x222   : > { %v2375_v58 = vpop.eup %2374  ;;  %2400 = vpow2.f32 %v1515_v34  ;;  %v1580_v37 = vpack.c.bf16 %v2373_v38, %v2361_v59  ;;  %v1517_v11 = vmul.f32 1.442695, %v1279_v51  ;;  %v1519_v27 = vmul.f32 1.442695, %v1280_v3 }
 0x223   : > { %v2377_v20 = vpop.eup %2376  ;;  %2402 = vpow2.f32 %v1389_v36  ;;  %v1377_v4 = vmul.f32 1.442695, %v1209_v45  ;;  %v1379_v16 = vmul.f32 1.442695, %v1210_v60  ;;  %v1042_v33 = vpop.xlane.xlu1 %1041  ;;  %v3686_v60 = vld [vmem:[#allocation84_spill] sm:$0xff] }
 0x224   : > { %v2379_v23 = vpop.eup %2378  ;;  %2404 = vpow2.f32 %v1391_v10  ;;  %1639 = vmatprep.subr.bf16.mxu0 %v1580_v37  ;;  %v1135_v5 = vpop.xlane.xlu0 %1134  ;;  %v1211_v57 = vsub.f32 %v3677_v1, %v1042_v33  ;;  %v1212_v44 = vsub.f32 %v3678_v18, %v1042_v33  ;;  %v3683_v10 = vld [vmem:[#allocation79_spill] sm:$0xff]  ;;  %v3688_v33 = vld [vmem:[#allocation72_spill] sm:$0xff] }
 0x225   : > { %v2381_v56 = vpop.eup %2380  ;;  %2406 = vpow2.f32 %v1377_v4  ;;  %1640 = vmatpush2.bf16.xpose.msra.mxu0 %v1579_v41  ;;  %v1273_v62 = vsub.f32 %v3675_v32, %v1135_v5  ;;  %v1274_v14 = vsub.f32 %v3676_v25, %v1135_v5  ;;  %v1611_v21 = vpack.c.bf16 %v2379_v23, %v2367_v53  ;;  %v3689_v32 = vld [vmem:[#allocation83_spill] sm:$0xff] }
 0x226   : > { %v2383_v61 = vpop.eup %2382  ;;  %2408 = vpow2.f32 %v1379_v16  ;;  %v1612_v30 = vpack.c.bf16 %v2381_v56, %v2369_v43  ;;  %v1381_v48 = vmul.f32 1.442695, %v1211_v57  ;;  %v1383_v54 = vmul.f32 1.442695, %v1212_v44 }
 0x227   : > { %v2385_v17 = vpop.eup %2384  ;;  %2410 = vpow2.f32 %v1517_v11  ;;  %v1505_v39 = vmul.f32 1.442695, %v1273_v62  ;;  %v1507_v55 = vmul.f32 1.442695, %v1274_v14  ;;  %v1138_v50 = vpop.xlane.xlu1 %1137  ;;  %v3690_v14 = vld [vmem:[#allocation85_spill] sm:$0xff] }
 0x228   : > { %v2387_v35 = vpop.eup %2386  ;;  %2412 = vpow2.f32 %v1519_v27  ;;  %1702 = vmatprep.subr.bf16.mxu1 %v1612_v30  ;;  %v1033_v59 = vpop.xlane.xlu0 %1032  ;;  %v1275_v24 = vsub.f32 %v3681_v8, %v1138_v50  ;;  %v1276_v15 = vsub.f32 %v3682_v31, %v1138_v50  ;;  %v3687_v27 = vld [vmem:[#allocation70_spill] sm:$0xff] }
 0x229   : > { %v2389_v6 = vpop.eup %2388  ;;  %2414 = vpow2.f32 %v1505_v39  ;;  %1703 = vmatpush2.bf16.xpose.msra.mxu1 %v1611_v21  ;;  %v1205_v12 = vsub.f32 %v3679_v7, %v1033_v59  ;;  %v1206_v28 = vsub.f32 %v3680_v63, %v1033_v59  ;;  %v1577_v53 = vpack.c.bf16 %v2387_v35, %v2375_v58  ;;  %v3692_v50 = vld [vmem:[#allocation74_spill] sm:$0xff] }
 0x22a   : > { %v2391_v19 = vpop.eup %2390  ;;  %2416 = vpow2.f32 %v1507_v55  ;;  %v1578_v46 = vpack.c.bf16 %v2389_v6, %v2377_v20  ;;  %v1509_v52 = vmul.f32 1.442695, %v1275_v24  ;;  %v1511_v2 = vmul.f32 1.442695, %v1276_v15 }
 0x22b   : > { %v2393_v49 = vpop.eup %2392  ;;  %2418 = vpow2.f32 %v1381_v48  ;;  %v1369_v40 = vmul.f32 1.442695, %v1205_v12  ;;  %v1371_v42 = vmul.f32 1.442695, %v1206_v28  ;;  %v1036_v36 = vpop.xlane.xlu1 %1035  ;;  %v3693_v12 = vld [vmem:[#allocation76_spill] sm:$0xff] }
 0x22c   : > { %v2395_v43 = vpop.eup %2394  ;;  %2420 = vpow2.f32 %v1383_v54  ;;  %1641 = vmatprep.subr.bf16.mxu0 %v1578_v46  ;;  %v1129_v34 = vpop.xlane.xlu0 %1128  ;;  %v1207_v45 = vsub.f32 %v3685_v22, %v1036_v36  ;;  %v1208_v47 = vsub.f32 %v3686_v60, %v1036_v36  ;;  %v3691_v54 = vld [vmem:[#allocation73_spill] sm:$0xff] }
 0x22d   : > { %v2397_v0 = vpop.eup %2396  ;;  %2422 = vpow2.f32 %v1369_v40  ;;  %1642 = vmatpush2.bf16.xpose.msra.mxu0 %v1577_v53  ;;  %v1269_v26 = vsub.f32 %v3683_v10, %v1129_v34  ;;  %v1270_v38 = vsub.f32 %v3684_v13, %v1129_v34  ;;  %v1609_v58 = vpack.c.bf16 %v2395_v43, %v2383_v61 }
 0x22e   : > { %v2399_v9 = vpop.eup %2398  ;;  %2424 = vpow2.f32 %v1371_v42  ;;  %v1610_v51 = vpack.c.bf16 %v2397_v0, %v2385_v17  ;;  %v1373_v37 = vmul.f32 1.442695, %v1207_v45  ;;  %v1375_v20 = vmul.f32 1.442695, %v1208_v47 }
 0x22f   : > { %v2401_v29 = vpop.eup %2400  ;;  %2426 = vpow2.f32 %v1509_v52  ;;  %v1497_v3 = vmul.f32 1.442695, %v1269_v26  ;;  %v1132_v16 = vpop.xlane.xlu1 %1131  ;;  %v1499_v23 = vmul.f32 1.442695, %v1270_v38  ;;  %v3695_v52 = vld [vmem:[#allocation75_spill] sm:$0xff] }
 0x230   : > { %v2403_v41 = vpop.eup %2402  ;;  %2428 = vpow2.f32 %v1511_v2  ;;  %1704 = vmatprep.subr.bf16.mxu1 %v1610_v51  ;;  %v1027_v4 = vpop.xlane.xlu0 %1026  ;;  %v1271_v62 = vsub.f32 %v3689_v32, %v1132_v16  ;;  %v1272_v1 = vsub.f32 %v3690_v14, %v1132_v16  ;;  %v3696_v2 = vld [vmem:[#allocation77_spill] sm:$0xff] }
 0x231   : > { %v2405_v11 = vpop.eup %2404  ;;  %1705 = vmatpush2.bf16.xpose.msra.mxu1 %v1609_v58  ;;  %v1201_v5 = vsub.f32 %v3687_v27, %v1027_v4  ;;  %v1202_v56 = vsub.f32 %v3688_v33, %v1027_v4  ;;  %2430 = vpow2.f32 %v1497_v3  ;;  %v1575_v61 = vpack.c.bf16 %v2403_v41, %v2391_v19  ;;  %v3694_v19 = vld [vmem:[#allocation71_spill] sm:$0xff] }
 0x232   : > { %v2407_v25 = vpop.eup %2406  ;;  %v1576_v57 = vpack.c.bf16 %v2405_v11, %v2393_v49  ;;  %2432 = vpow2.f32 %v1373_v37  ;;  %v1501_v30 = vmul.f32 1.442695, %v1271_v62  ;;  %v1503_v17 = vmul.f32 1.442695, %v1272_v1 }
 0x233   : > { %v2409_v18 = vpop.eup %2408  ;;  %v1361_v44 = vmul.f32 1.442695, %v1201_v5  ;;  %2434 = vpow2.f32 %v1375_v20  ;;  %v1030_v55 = vpop.xlane.xlu1 %1029  ;;  %v1363_v35 = vmul.f32 1.442695, %v1202_v56 }
 0x234   : > { %v2411_v21 = vpop.eup %2410  ;;  %1643 = vmatprep.subr.bf16.mxu0 %v1576_v57  ;;  %v1123_v39 = vpop.xlane.xlu0 %1122  ;;  %2436 = vpow2.f32 %v1499_v23  ;;  %v1203_v6 = vsub.f32 %v3692_v50, %v1030_v55  ;;  %v1204_v63 = vsub.f32 %v3693_v12, %v1030_v55  ;;  %v2487_v55 = vld [vmem:[%s2592_s28 + $0x38] ss:$8 sps:$4 sm:$0xff]  }
 0x235   : > { %v2413_v48 = vpop.eup %2412  ;;  %1644 = vmatpush2.bf16.xpose.msra.mxu0 %v1575_v61  ;;  %v1266_v59 = vsub.f32 %v3691_v54, %v1123_v39  ;;  %2438 = vpow2.f32 %v1361_v44  ;;  %v1607_v8 = vpack.c.bf16 %v2411_v21, %v2399_v9  ;;  %v1265_v31 = vsub.f32 %v3694_v19, %v1123_v39  ;;  %v2483_v44 = vld [vmem:[%s2592_s28 + $0x14] ss:$8 sps:$4 sm:$0xff]   ;;  %v3697_v39 = vld [vmem:[#allocation2_spill] sm:$0xff] }
 0x236   : > { %v2415_v7 = vpop.eup %2414  ;;  %v1608_v28 = vpack.c.bf16 %v2413_v48, %v2401_v29  ;;  %2440 = vpow2.f32 %v1501_v30  ;;  %v1365_v46 = vmul.f32 1.442695, %v1203_v6  ;;  %v1367_v49 = vmul.f32 1.442695, %v1204_v63  ;;  %v2484_v30 = vld [vmem:[%s2592_s28 + $0x28] ss:$8 sps:$4 sm:$0xff]  }
 0x237   : > { %v2417_v24 = vpop.eup %2416  ;;  %v1491_v15 = vmul.f32 1.442695, %v1266_v59  ;;  %2442 = vpow2.f32 %v1503_v17  ;;  %v1126_v40 = vpop.xlane.xlu1 %1125  ;;  %v1489_v13 = vmul.f32 1.442695, %v1265_v31  ;;  %v2485_v21 = vld [vmem:[%s2592_s28 + $0x3c] ss:$8 sps:$4 sm:$0xff]  }
 0x238   : > { %v2419_v53 = vpop.eup %2418  ;;  %1706 = vmatprep.subr.bf16.mxu1 %v1608_v28  ;;  %2444 = vpow2.f32 %v1363_v35  ;;  %v1267_v43 = vsub.f32 %v3695_v52, %v1126_v40  ;;  %v1268_v34 = vsub.f32 %v3696_v2, %v1126_v40  ;;  %v2486_v17 = vld [vmem:[%s2592_s28 + $0x10] ss:$8 sps:$4 sm:$0xff]   ;;  %v3698_v48 = vld [vmem:[#allocation3_spill] sm:$0xff] }
 0x239   : > { %v2421_v42 = vpop.eup %2420  ;;  %1707 = vmatpush2.bf16.xpose.msra.mxu1 %v1607_v8  ;;  %v1573_v36 = vpack.c.bf16 %v2419_v53, %v2407_v25  ;;  %2446 = vpow2.f32 %v1491_v15  ;;  %v3699_v35 = vld [vmem:[#allocation4_spill] sm:$0xff]  ;;  %v3700_v54 = vld [vmem:[#allocation5_spill] sm:$0xff] }
 0x23a   : > { %v2423_v0 = vpop.eup %2422  ;;  %v1574_v10 = vpack.c.bf16 %v2421_v42, %v2409_v18  ;;  %2448 = vpow2.f32 %v1365_v46  ;;  %v1493_v38 = vmul.f32 1.442695, %v1267_v43  ;;  %v1495_v22 = vmul.f32 1.442695, %v1268_v34  ;;  %v2482_v18 = vld [vmem:[%s2592_s28] ss:$8 sps:$4 sm:$0xff]  }
 0x23b   : > { %v2425_v26 = vpop.eup %2424  ;;  %2450 = vpow2.f32 %v1367_v49 }
 0x23c   : > { %v2427_v45 = vpop.eup %2426  ;;  %1645 = vmatprep.subr.bf16.mxu0 %v1574_v10  ;;  %2452 = vpow2.f32 %v1493_v38 }
 0x23d   : > { %v2429_v9 = vpop.eup %2428  ;;  %1646 = vmatpush2.bf16.xpose.msra.mxu0 %v1573_v36  ;;  %v1605_v60 = vpack.c.bf16 %v2427_v45, %v2415_v7  ;;  %2454 = vpow2.f32 %v1495_v22 }
 0x23e   : > { %v1606_v47 = vpack.c.bf16 %v2429_v9, %v2417_v24  ;;  %v2431_v51 = vpop.eup %2430  ;;  %2456 = vpow2.f32 %v1489_v13 }
 0x23f   : > { %v2433_v58 = vpop.eup %2432 }
 0x240   : > { %1708 = vmatprep.subr.bf16.mxu1 %v1606_v47  ;;  %v2435_v29 = vpop.eup %2434  ;;  %v1571_v3 = vpack.c.bf16 %v2433_v58, %v2423_v0 }
 0x241   : > { %1709 = vmatpush2.bf16.xpose.msra.mxu1 %v1605_v60  ;;  %v2437_v37 = vpop.eup %2436  ;;  %v1572_v41 = vpack.c.bf16 %v2435_v29, %v2425_v26 }
 0x242   : > { %v2439_v20 = vpop.eup %2438 }
 0x243   : > { %v2441_v4 = vpop.eup %2440  ;;  %1647 = vmatprep.subr.bf16.mxu0 %v1572_v41 }
 0x244   : > { %v2443_v16 = vpop.eup %2442  ;;  %v1603_v11 = vpack.c.bf16 %v2441_v4, %v2431_v51 }
 0x245   : > { %1648 = vmatpush2.bf16.xpose.msra.mxu0 %v1571_v3  ;;  %v2445_v23 = vpop.eup %2444  ;;  %v1604_v27 = vpack.c.bf16 %v2443_v16, %v2437_v37 }
 0x246   : > { %v2447_v5 = vpop.eup %2446 }
 0x247   : > { %v2449_v33 = vpop.eup %2448  ;;  %1710 = vmatprep.subr.bf16.mxu1 %v1604_v27 }
 0x248   : > { %v2451_v56 = vpop.eup %2450  ;;  %v1569_v32 = vpack.c.bf16 %v2449_v33, %v2439_v20 }
 0x249   : > { %1711 = vmatpush2.bf16.xpose.msra.mxu1 %v1603_v11  ;;  %v2453_v62 = vpop.eup %2452  ;;  %v1570_v25 = vpack.c.bf16 %v2451_v56, %v2445_v23 }
 0x24a   : > { %v2455_v14 = vpop.eup %2454 }
 0x24b   : > { %v2457_v1 = vpop.eup %2456  ;;  %1649 = vmatprep.subr.bf16.mxu0 %v1570_v25  ;;  %v1602_v57 = vpack.c.bf16 %v2455_v14, %v2447_v5 }
 0x24c   : > { %v1601_v61 = vpack.c.bf16 %v2453_v62, %v2457_v1  ;;  %v1819_v62 = vlaneseq }
 0x24d   : > { %1650 = vmatpush2.bf16.xpose.msra.mxu0 %v1569_v32  ;;  %1712 = vmatprep.subr.bf16.mxu1 %v1602_v57 }
 0x24e   : > { %v1820_v25 = vshrl.u32 %v1819_v62, 7 }
 0x250   : > { %v1821_v57 = vsub.s32 1, %v1820_v25 }
 0x251   : > { %1713 = vmatpush2.bf16.xpose.msra.mxu1 %v1601_v61 }
 0x254   : > { %1652 = vmatmul.mubr.bf16.vlgmr.msra.gmra.mxu0 %v2482_v18 }
 0x255   : > { %1661 = vmatprep.mubr.bf16.mxu0 %v2483_v44 }
 0x258   : > { %1715 = vmatmul.mubr.bf16.vlgmr.msra.gmra.mxu1 %v2484_v30 }
 0x259   : > { %1724 = vmatprep.mubr.bf16.mxu1 %v2485_v21  ;;  %v1787_v21 = vld [vmem:[%s2587_s25] sm:$0xff] }
 0x25c   : > { %1662 = vmatmul.mubr.bf16.gmra.mxu0 %v2486_v17 }
 0x25d   : > { %1671 = vmatprep.mubr.bf16.mxu0 %v3697_v39 }
 0x260   : > { %1725 = vmatmul.mubr.bf16.gmra.mxu1 %v2487_v55 }
 0x261   : > { %1734 = vmatprep.mubr.bf16.mxu1 %v3698_v48 }
 0x264   : > { %1672 = vmatmul.mubr.bf16.gmra.mxu0 %v3699_v35  ;;  %v1789_v35 = vld [vmem:[%s2587_s25 + $0x10] sm:$0xff] }
 0x268   : > { %1735 = vmatmul.mubr.bf16.gmra.mxu1 %v3700_v54  ;;  %v1791_v54 = vld [vmem:[%s2587_s25 + $0x20] sm:$0xff] }
 0x314   : > { %v3262_v59 = vpop.f32.mrf.mxu0 }
 0x316   : > { %v3264_v50 = vpop.f32.mrf.mxu0 }
 0x318   : > { %v3266_v6 = vpop.f32.mrf.mxu0  ;;  %v3268_v7 = vpop.f32.mrf.mxu1 }
 0x31a   : > { %v3270_v12 = vpop.f32.mrf.mxu0  ;;  %v3272_v63 = vpop.f32.mrf.mxu1 }
 0x31c   : > { %v3274_v28 = vpop.f32.mrf.mxu0  ;;  %v3276_v8 = vpop.f32.mrf.mxu1 }
 0x31e   : > { %v3278_v24 = vpop.f32.mrf.mxu0  ;;  %v3280_v19 = vpop.f32.mrf.mxu1 }
 0x320   : > { %v3282_v31 = vpop.f32.mrf.mxu0  ;;  %v3284_v15 = vpop.f32.mrf.mxu1 }
 0x322   : > { %v3286_v46 = vpop.f32.mrf.mxu0  ;;  %v3288_v53 = vpop.f32.mrf.mxu1 }
 0x324   : > { %v1673_v49 = vpop.f32.mrf.mxu0  ;;  %v3290_v40 = vpop.f32.mrf.mxu1 }
 0x325   : > { %2458 = vrcp.f32 %v1673_v49 }
 0x326   : > { %v1675_v42 = vpop.f32.mrf.mxu0  ;;  %v3292_v52 = vpop.f32.mrf.mxu1 }
 0x327   : > { %2460 = vrcp.f32 %v1675_v42 }
 0x328   : > { %v1677_v43 = vpop.f32.mrf.mxu0  ;;  %v1736_v2 = vpop.f32.mrf.mxu1 }
 0x329   : > { %2462 = vrcp.f32 %v1736_v2 }
 0x32a   : > { %v1678_v34 = vpop.f32.mrf.mxu0  ;;  %v1738_v36 = vpop.f32.mrf.mxu1 }
 0x32b   : > { %2464 = vrcp.f32 %v1738_v36 }
 0x32c   : > { %v1740_v0 = vpop.f32.mrf.mxu1 }
 0x32e   : > { %v1741_v10 = vpop.f32.mrf.mxu1 }
 0x332   : > { %v2459_v26 = vpop.eup %2458 }
 0x333   : > { %v1751_v13 = vrot.slane %v2459_v26, 1 }
 0x334   : > { %v2461_v38 = vpop.eup %2460 }
 0x335   : > { %v1759_v22 = vmul.f32 %v1751_v13, %v1673_v49  ;;  %v1752_v45 = vrot.slane %v2461_v38, 1  ;;  %v1793_v49 = vld [vmem:[%s2587_s25 + $0x30] sm:$0xff] }
 0x336   : > { %v2463_v9 = vpop.eup %2462 }
 0x337   : > { %v2102_v60 = vmul.f32 -1.442695, %v1759_v22  ;;  %v1760_v47 = vmul.f32 %v1752_v45, %v1675_v42  ;;  %v1753_v51 = vrot.slane %v2463_v9, 1 }
 0x338   : > { %v3294_v58 = vpop.eup %2464 }
 0x339   : > { %2466 = vpow2.f32 %v2102_v60  ;;  %v2103_v29 = vmul.f32 -1.442695, %v1760_v47  ;;  %v1761_v3 = vmul.f32 %v1753_v51, %v1736_v2  ;;  %v1754_v37 = vrot.slane %v3294_v58, 1  ;;  %v1792_v60 = vld [vmem:[%s2587_s25 + $0x28] sm:$0xff]  ;;  %v1795_v51 = vld [vmem:[%s2587_s25 + $0x40] sm:$0xff] }
 0x33b   : > { %2468 = vpow2.f32 %v2103_v29  ;;  %v2104_v41 = vmul.f32 -1.442695, %v1761_v3  ;;  %v1762_v20 = vmul.f32 %v1754_v37, %v1738_v36  ;;  %v1788_v36 = vld [vmem:[%s2587_s25 + $0x8] sm:$0xff] }
 0x33d   : > { %2470 = vpow2.f32 %v2104_v41  ;;  %v2105_v4 = vmul.f32 -1.442695, %v1762_v20  ;;  %v1799_v20 = vld [vmem:[%s2587_s25 + $0x60] sm:$0xff] }
 0x33f   : > { %2472 = vpow2.f32 %v2105_v4 }
 0x346   : > { %v2467_v16 = vpop.eup %2466 }
 0x347   : > { %v1775_v11 = vadd.f32 1.0, %v2467_v16 }
 0x348   : > { %v2469_v23 = vpop.eup %2468 }
 0x349   : > { %2474 = vrcp.f32 %v1775_v11  ;;  %v1776_v27 = vadd.f32 1.0, %v2469_v23 }
 0x34a   : > { %v2471_v5 = vpop.eup %2470 }
 0x34b   : > { %2476 = vrcp.f32 %v1776_v27  ;;  %v1777_v33 = vadd.f32 1.0, %v2471_v5 }
 0x34c   : > { %v2473_v56 = vpop.eup %2472 }
 0x34d   : > { %2478 = vrcp.f32 %v1777_v33  ;;  %v1778_v32 = vadd.f32 1.0, %v2473_v56 }
 0x34f   : > { %2480 = vrcp.f32 %v1778_v32 }
 0x356   : > { %v2475_v14 = vpop.eup %2474 }
 0x357   : > { %v1807_v1 = vrot.slane %v2475_v14, 7 }
 0x358   : > { %v2477_v61 = vpop.eup %2476 }
 0x359   : > { %v1815_v18 = vmul.f32 %v2459_v26, %v1807_v1  ;;  %v1808_v44 = vrot.slane %v2477_v61, 7 }
 0x35a   : > { %v2479_v30 = vpop.eup %2478 }
 0x35b   : > { %v1822_v17 = vrot.slane %v1815_v18, %v1821_v57  ;;  %v1816_v39 = vmul.f32 %v2461_v38, %v1808_v44  ;;  %v1809_v55 = vrot.slane %v2479_v30, 7 }
 0x35c   : > { %v2481_v48 = vpop.eup %2480 }
 0x35d   : > { %v1835_v42 = vmul.f32 %v1822_v17, %v3262_v59  ;;  %v1837_v43 = vmul.f32 %v1822_v17, %v3266_v6  ;;  %v1839_v2 = vmul.f32 %v1822_v17, %v3274_v28  ;;  %v1841_v34 = vmul.f32 %v1822_v17, %v3282_v31  ;;  %v1790_v59 = vld [vmem:[%s2587_s25 + $0x18] sm:$0xff] }
 0x35e   : > { %v1826_v0 = vrot.slane %v1816_v39, %v1821_v57  ;;  %v1817_v10 = vmul.f32 %v2463_v9, %v1809_v55  ;;  %v1810_v26 = vrot.slane %v2481_v48, 7  ;;  %v1794_v6 = vld [vmem:[%s2587_s25 + $0x38] sm:$0xff] }
 0x35f   : > { %v1851_v13 = vadd.f32 %v1835_v42, %v1787_v21  ;;  %v1853_v38 = vadd.f32 %v1837_v43, %v1789_v35  ;;  %v1855_v22 = vadd.f32 %v1839_v2, %v1791_v54  ;;  %v1857_v45 = vadd.f32 %v1841_v34, %v1793_v49 }
 0x360   : > { %v1836_v28 = vmul.f32 %v1826_v0, %v3264_v50  ;;  %v1838_v31 = vmul.f32 %v1826_v0, %v3270_v12  ;;  %v1840_v47 = vmul.f32 %v1826_v0, %v3278_v24  ;;  %v1842_v9 = vmul.f32 %v1826_v0, %v3286_v46  ;;  %v1797_v24 = vld [vmem:[%s2587_s25 + $0x50] sm:$0xff] }
 0x361   : > { %1867 = vst [vmem:[%s2587_s25] sm:$0xff] %v1851_v13  ;;  %1869 = vst [vmem:[%s2587_s25 + $0x10] sm:$0xff] %v1853_v38  ;;  %v1830_v29 = vrot.slane %v1817_v10, %v1821_v57  ;;  %v1818_v50 = vmul.f32 %v3294_v58, %v1810_v26  ;;  %v1801_v46 = vld [vmem:[%s2587_s25 + $0x70] sm:$0xff]  ;;  %v1796_v58 = vld [vmem:[%s2587_s25 + $0x48] sm:$0xff] }
 0x362   : > { %1871 = vst [vmem:[%s2587_s25 + $0x20] sm:$0xff] %v1855_v22  ;;  %1873 = vst [vmem:[%s2587_s25 + $0x30] sm:$0xff] %v1857_v45  ;;  %v1852_v3 = vadd.f32 %v1836_v28, %v1788_v36  ;;  %v1854_v12 = vadd.f32 %v1838_v31, %v1790_v59  ;;  %v1856_v37 = vadd.f32 %v1840_v47, %v1792_v60 }
 0x363   : > { %v1858_v41 = vadd.f32 %v1842_v9, %v1794_v6  ;;  %v1843_v4 = vmul.f32 %v1830_v29, %v3268_v7  ;;  %v1845_v16 = vmul.f32 %v1830_v29, %v3276_v8  ;;  %v1847_v11 = vmul.f32 %v1830_v29, %v3284_v15  ;;  %v1798_v8 = vld [vmem:[%s2587_s25 + $0x58] sm:$0xff]  ;;  %v1800_v15 = vld [vmem:[%s2587_s25 + $0x68] sm:$0xff] }
 0x364   : > { %v1849_v23 = vmul.f32 %v1830_v29, %v3290_v40  ;;  %1868 = vst [vmem:[%s2587_s25 + $0x8] sm:$0xff] %v1852_v3  ;;  %1870 = vst [vmem:[%s2587_s25 + $0x18] sm:$0xff] %v1854_v12  ;;  %v1834_v27 = vrot.slane %v1818_v50, %v1821_v57  ;;  %v1802_v40 = vld [vmem:[%s2587_s25 + $0x78] sm:$0xff] }
 0x365   : > { %1872 = vst [vmem:[%s2587_s25 + $0x28] sm:$0xff] %v1856_v37  ;;  %1874 = vst [vmem:[%s2587_s25 + $0x38] sm:$0xff] %v1858_v41  ;;  %v1859_v5 = vadd.f32 %v1843_v4, %v1795_v51  ;;  %v1861_v33 = vadd.f32 %v1845_v16, %v1797_v24  ;;  %v1863_v7 = vadd.f32 %v1847_v11, %v1799_v20 }
 0x366   : > { %v1865_v56 = vadd.f32 %v1849_v23, %v1801_v46  ;;  %v1844_v32 = vmul.f32 %v1834_v27, %v3272_v63  ;;  %v1846_v62 = vmul.f32 %v1834_v27, %v3280_v19  ;;  %v1848_v25 = vmul.f32 %v1834_v27, %v3288_v53 }
 0x367   : > { %v1850_v14 = vmul.f32 %v1834_v27, %v3292_v52  ;;  %1875 = vst [vmem:[%s2587_s25 + $0x40] sm:$0xff] %v1859_v5  ;;  %1877 = vst [vmem:[%s2587_s25 + $0x50] sm:$0xff] %v1861_v33  ;;  %1886 = sbr.rel (%p2106_p8) target bundleno = 887 (0x377), region = 36 }
 0x368   : > { %1879 = vst [vmem:[%s2587_s25 + $0x60] sm:$0xff] %v1863_v7  ;;  %1881 = vst [vmem:[%s2587_s25 + $0x70] sm:$0xff] %v1865_v56  ;;  %v1860_v1 = vadd.f32 %v1844_v32, %v1796_v58  ;;  %v1862_v57 = vadd.f32 %v1846_v62, %v1798_v8  ;;  %v1864_v61 = vadd.f32 %v1848_v25, %v1800_v15 }
 0x369   : > { %v1866_v18 = vadd.f32 %v1850_v14, %v1802_v40 }
 0x36a   : > { %1876 = vst [vmem:[%s2587_s25 + $0x48] sm:$0xff] %v1860_v1  ;;  %1878 = vst [vmem:[%s2587_s25 + $0x58] sm:$0xff] %v1862_v57 }
 0x36b   : > { %1880 = vst [vmem:[%s2587_s25 + $0x68] sm:$0xff] %v1864_v61  ;;  %1882 = vst [vmem:[%s2587_s25 + $0x78] sm:$0xff] %v1866_v18 }
 0x36c   : > { %v1887_v63 = vld [vmem:[%s2587_s25] sm:$0xff]  ;;  %v1888_v19 = vld [vmem:[%s2587_s25 + $0x8] sm:$0xff]  ;;  %v1889_v53 = vld [vmem:[%s2587_s25 + $0x10] sm:$0xff] }
 0x36d   : > { %v1903_v52 = vmul.f32 0.0625, %v1887_v63  ;;  %v1904_v44 = vmul.f32 0.0625, %v1888_v19  ;;  %v1905_v30 = vmul.f32 0.0625, %v1889_v53  ;;  %v1890_v21 = vld [vmem:[%s2587_s25 + $0x18] sm:$0xff]  ;;  %v1891_v17 = vld [vmem:[%s2587_s25 + $0x20] sm:$0xff]  ;;  %v1892_v39 = vld [vmem:[%s2587_s25 + $0x28] sm:$0xff] }
 0x36e   : > { %v1906_v55 = vmul.f32 0.0625, %v1890_v21  ;;  %v1907_v48 = vmul.f32 0.0625, %v1891_v17  ;;  %v1908_v35 = vmul.f32 0.0625, %v1892_v39  ;;  %v1893_v54 = vld [vmem:[%s2587_s25 + $0x30] sm:$0xff]  ;;  %v1894_v49 = vld [vmem:[%s2587_s25 + $0x38] sm:$0xff]  ;;  %v1895_v42 = vld [vmem:[%s2587_s25 + $0x40] sm:$0xff] }
 0x36f   : > { %1919 = vst [vmem:[%s2587_s25] sm:$0xff] %v1903_v52  ;;  %1920 = vst [vmem:[%s2587_s25 + $0x8] sm:$0xff] %v1904_v44  ;;  %v1909_v43 = vmul.f32 0.0625, %v1893_v54  ;;  %v1910_v2 = vmul.f32 0.0625, %v1894_v49  ;;  %v1911_v34 = vmul.f32 0.0625, %v1895_v42  ;;  %v1897_v0 = vld [vmem:[%s2587_s25 + $0x50] sm:$0xff]  ;;  %v1899_v22 = vld [vmem:[%s2587_s25 + $0x60] sm:$0xff] }
 0x370   : > { %1921 = vst [vmem:[%s2587_s25 + $0x10] sm:$0xff] %v1905_v30  ;;  %1922 = vst [vmem:[%s2587_s25 + $0x18] sm:$0xff] %v1906_v55  ;;  %v1913_v13 = vmul.f32 0.0625, %v1897_v0  ;;  %v1901_v59 = vld [vmem:[%s2587_s25 + $0x70] sm:$0xff]  ;;  %v1915_v60 = vmul.f32 0.0625, %v1899_v22 }
 0x371   : > { %v1896_v36 = vld [vmem:[%s2587_s25 + $0x48] sm:$0xff]  ;;  %v1898_v10 = vld [vmem:[%s2587_s25 + $0x58] sm:$0xff]  ;;  %1923 = vst [vmem:[%s2587_s25 + $0x20] sm:$0xff] %v1907_v48  ;;  %1924 = vst [vmem:[%s2587_s25 + $0x28] sm:$0xff] %v1908_v35  ;;  %v1917_v28 = vmul.f32 0.0625, %v1901_v59 }
 0x372   : > { %v1912_v26 = vmul.f32 0.0625, %v1896_v36  ;;  %v1914_v38 = vmul.f32 0.0625, %v1898_v10  ;;  %v1900_v45 = vld [vmem:[%s2587_s25 + $0x68] sm:$0xff]  ;;  %1925 = vst [vmem:[%s2587_s25 + $0x30] sm:$0xff] %v1909_v43  ;;  %1926 = vst [vmem:[%s2587_s25 + $0x38] sm:$0xff] %v1910_v2  ;;  %v1902_v31 = vld [vmem:[%s2587_s25 + $0x78] sm:$0xff] }
 0x373   : > { %1927 = vst [vmem:[%s2587_s25 + $0x40] sm:$0xff] %v1911_v34  ;;  %v1916_v6 = vmul.f32 0.0625, %v1900_v45  ;;  %1929 = vst [vmem:[%s2587_s25 + $0x50] sm:$0xff] %v1913_v13  ;;  %v1918_v47 = vmul.f32 0.0625, %v1902_v31 }
 0x374   : > { %1928 = vst [vmem:[%s2587_s25 + $0x48] sm:$0xff] %v1912_v26  ;;  %1930 = vst [vmem:[%s2587_s25 + $0x58] sm:$0xff] %v1914_v38 }
 0x375   : > { %1931 = vst [vmem:[%s2587_s25 + $0x60] sm:$0xff] %v1915_v60  ;;  %1932 = vst [vmem:[%s2587_s25 + $0x68] sm:$0xff] %v1916_v6 }
 0x376   : > { %1933 = vst [vmem:[%s2587_s25 + $0x70] sm:$0xff] %v1917_v28  ;;  %1934 = vst [vmem:[%s2587_s25 + $0x78] sm:$0xff] %v1918_v47 }
 0x377 PF: > { %s12_s13 = sadd.s32 1, %s2526_s13   ;;  %s3701_s9 = smov %s2518_s11 }
 0x378   : > { %p9_p9 = scmp.ge.s32.totalorder %s12_s13, 11   ;;  %s3702_s10 = smov %s2522_s12 }
 0x379   : > { %s3703_s11 = smov %s3706_s14  ;;  %s3704_s12 = smov %s3710_s15 }
 0x37a   :  { %11 = sbr.rel (!%p9_p9) target bundleno = 3 (0x3), region = 69 }

</bundles_post_ra>
